<compile_context>
chip_gen: v7x
topology: tpu7x:2x2x1
jax: 0.10.0
libtpu: 0.0.40
codegen_flags: <defaults>
</compile_context>

<pallas_src>
import jax
import jax.numpy as jnp
import numpy as np
from jax.experimental import pallas as pl
from jax.experimental.pallas import tpu as pltpu

OUT_PAD = 128  # lane-dense width of the kernel output slab (column 0 is the Linear(d,1) result)


def _round_up(x, m):
    return ((x + m - 1) // m) * m


def _make_kernel(layer_dims, n_pads):
    """refs = [x, (G, g) per layer, w_out_pad, b_out_pad, out]."""

    def kernel(*refs):
        x = refs[0][...]                                      # (bt, d0) f32 batch tile
        idx = 1
        for (d, n), n_pad in zip(layer_dims, n_pads):
            G_ref, g_ref = refs[idx], refs[idx + 1]
            idx += 2
            # One MXU matmul builds every (z @ W_k)_j column; the homogeneous "1" row of each
            # W_k is folded into the broadcast-add of g.
            U = jnp.dot(x, G_ref[...], preferred_element_type=jnp.float32) + g_ref[...]
            # y[:, k] = sum_j U[:, j*n_pad + k] * z_j = z^T W_k z.
            # Every slice start is a multiple of 128 lanes (n_pad-aligned).  d is tiny here;
            # for large d this loop should become an MXU identity-block matmul (module TODO).
            y = U[:, d * n_pad:(d + 1) * n_pad]               # j == d term (z_d == 1)
            for j in range(d):                                # small static unroll -> VPU FMAs
                y = y + U[:, j * n_pad:(j + 1) * n_pad] * x[:, j:j + 1]
            x = y                                             # (bt, n_pad); columns >= n are 0
        w_ref, b_ref, out_ref = refs[idx], refs[idx + 1], refs[idx + 2]
        # Lane-dense (bt, OUT_PAD) store; only column 0 carries Linear(d, 1) + bias.
        out_ref[...] = jnp.dot(x, w_ref[...], preferred_element_type=jnp.float32) + b_ref[...]

    return kernel


def init_params(key, layers, in_features):
    """Deterministic synthetic parameters matching the PyTorch module's shapes."""
    layer_params = []
    d = in_features
    for n in layers:
        D = d + 1
        key, sub = jax.random.split(key)
        W = jax.random.normal(sub, (n, D, D), dtype=jnp.float32)
        mask = jnp.triu(jnp.ones((D, D), jnp.float32))        # upper-triangular (incl. diag)
        layer_params.append(W * mask[None])
        d = n
    key, kw, kb = jax.random.split(key, 3)
    w_out = jax.random.normal(kw, (d, 1), dtype=jnp.float32) * 0.1   # Linear(d, 1) weight^T
    b_out = jax.random.normal(kb, (1, 1), dtype=jnp.float32) * 0.1   # Linear bias
    return layer_params, w_out, b_out


def build_layer_mats(W_stack, in_width, n_pad):
    """(n, D, D) masked neuron weights -> lane-padded G (in_width, D*n_pad), g (1, D*n_pad).

    Column index j*n_pad + k holds W_k[:, j].  Neuron columns k >= n and input rows >= d are
    zero, so padded positions produce exactly-zero activations for the next layer."""
    n, D, _ = W_stack.shape
    d = D - 1
    Wt = jnp.transpose(W_stack, (1, 2, 0))                    # [r, j, k] = W_k[r, j]
    Wt = jnp.pad(Wt, ((0, 0), (0, 0), (0, n_pad - n)))        # pad neuron axis n -> n_pad
    flat = Wt.reshape(D, D * n_pad)                           # column index = j*n_pad + k
    G = jnp.zeros((in_width, D * n_pad), jnp.float32).at[:d, :].set(flat[:d])
    g = flat[d:d + 1]                                         # homogeneous "1" row of each W_k
    return G, g


def pn_forward(x, layer_params, w_out, b_out, *, block_b=4096, vmem_budget_bytes=24 << 20):
    B, d0 = x.shape

    # ---- lane-padded, VMEM-resident parameter matrices ----
    layer_dims, n_pads, params = [], [], []
    width = d0                                                # lane width of current activation
    for W in layer_params:
        n, D, _ = W.shape
        d = D - 1
        n_pad = _round_up(n, 128)
        layer_dims.append((d, n))
        n_pads.append(n_pad)
        G, g = build_layer_mats(W, width, n_pad)
        params += [G, g]
        width = n_pad
    d_last = layer_dims[-1][1] if layer_dims else d0
    w_pad = jnp.zeros((width, OUT_PAD), jnp.float32).at[:d_last, :1].set(w_out)
    b_pad = jnp.zeros((1, OUT_PAD), jnp.float32).at[:, :1].set(b_out)
    params += [w_pad, b_pad]
    param_bytes = sum(int(p.size) for p in params) * 4

    # ---- batch tile: as large as the VMEM budget allows, >= 2 grid steps when possible ----
    def lanes(c):
        return _round_up(max(int(c), 1), 128)                 # a (bt, c) tile occupies >=128 lanes

    per_row = 2 * lanes(d0) + 2 * OUT_PAD                     # double-buffered streamed x / out
    for (d, n), n_pad in zip(layer_dims, n_pads):
        per_row += (d + 1) * n_pad + n_pad                    # U intermediate + layer output
    per_row_bytes = per_row * 4
    bt_cap = max(8, (vmem_budget_bytes - 2 * param_bytes) // per_row_bytes)
    bt = max(8, min(int(block_b), int(bt_cap), _round_up(B, 8)))
    bt = max(8, (bt // 8) * 8)
    if B > 8 and bt >= _round_up(B, 8):                       # split so v7x's two TCs both work
        bt = min(bt, _round_up(int(pl.cdiv(B, 2)), 8))
    Bp = _round_up(B, bt)
    xp = x if Bp == B else jnp.pad(x, ((0, Bp - B), (0, 0)))  # padded rows -> discarded garbage

    # ---- advisory cost estimate (padded = actual MXU/HBM work) ----
    flops = 0
    w_in = d0
    for (d, n), n_pad in zip(layer_dims, n_pads):
        flops += 2 * Bp * w_in * (d + 1) * n_pad              # U = x @ G
        flops += 2 * Bp * d * n_pad                           # per-j broadcast FMAs
        w_in = n_pad
    flops += 2 * Bp * w_in * OUT_PAD                          # final Linear slab
    bytes_accessed = Bp * d0 * 4 + Bp * OUT_PAD * 4 + param_bytes

    vmem_limit = int(min(max(32 << 20, vmem_budget_bytes + (4 << 20)), 56 << 20))
    kernel = _make_kernel(layer_dims, n_pads)
    x_spec = pl.BlockSpec((bt, d0), lambda i: (i, 0))
    out_spec = pl.BlockSpec((bt, OUT_PAD), lambda i: (i, 0))

    def run(single_buffer_params):
        if single_buffer_params:
            # Constant-index_map params only need one VMEM buffer -> halves resident footprint.
            p_specs = [pl.BlockSpec(p.shape, lambda i: (0, 0), pipeline_mode=pl.Buffered(1))
                       for p in params]
        else:
            p_specs = [pl.BlockSpec(p.shape, lambda i: (0, 0)) for p in params]
        call = pl.pallas_call(
            kernel,
            out_shape=jax.ShapeDtypeStruct((Bp, OUT_PAD), jnp.float32),
            grid=(Bp // bt,),
            in_specs=[x_spec] + p_specs,
            out_specs=out_spec,
            compiler_params=pltpu.CompilerParams(
                dimension_semantics=("parallel",),
                vmem_limit_bytes=vmem_limit),
            cost_estimate=pl.CostEstimate(
                flops=int(flops), transcendentals=0, bytes_accessed=int(bytes_accessed)),
        )
        return jax.block_until_ready(call(xp, *params))

    try:
        out = run(single_buffer_params=True)
    except Exception:
        # pipeline_mode / pl.Buffered(1) not supported by this JAX build: use the default
        # double-buffered parameter specs (already accounted for in the VMEM budget above).
        out = run(single_buffer_params=False)

    return out[:B, :1]


def pn_reference(x, layer_params, w_out, b_out):
    """Pure-JAX reference reproducing the PyTorch forward exactly (full f32 precision)."""
    hp = jax.lax.Precision.HIGHEST
    for W in layer_params:
        B = x.shape[0]
        z = jnp.concatenate([x, jnp.ones((B, 1), jnp.float32)], axis=1)
        x = jnp.einsum("bi,kij,bj->bk", z, W, z, precision=hp)
    return jnp.dot(x, w_out, precision=hp) + b_out


if __name__ == "__main__":
    in_features = 4
    layers = [4, 3]          # Polynomial_Network(layers=[4, 3], in_features=4)
    B = 50                   # non-multiple of the batch tile -> exercises padding + 2-step grid

    key = jax.random.PRNGKey(0)
    key, kx, kp = jax.random.split(key, 3)
    x = jax.random.normal(kx, (B, in_features), dtype=jnp.float32)
    layer_params, w_out, b_out = init_params(kp, layers, in_features)

    out = pn_forward(x, layer_params, w_out, b_out)
    out = jax.block_until_ready(out)

    ref = pn_reference(x, layer_params, w_out, b_out)
    assert out.shape == (B, 1), out.shape
    np.testing.assert_allclose(np.asarray(out), np.asarray(ref), rtol=1e-3, atol=1e-3)
    print("KERNEL_OK")
</pallas_src>

<mosaic_0001>
module attributes {stable_mosaic.version = 11 : i64} {
  func.func @kernel(%arg0: i32, %arg1: memref<32x4xf32, #tpu.memory_space<vmem>>, %arg2: memref<4x640xf32, #tpu.memory_space<vmem>>, %arg3: memref<1x640xf32, #tpu.memory_space<vmem>>, %arg4: memref<128x640xf32, #tpu.memory_space<vmem>>, %arg5: memref<1x640xf32, #tpu.memory_space<vmem>>, %arg6: memref<128x128xf32, #tpu.memory_space<vmem>>, %arg7: memref<1x128xf32, #tpu.memory_space<vmem>>, %arg8: memref<32x128xf32, #tpu.memory_space<vmem>>) attributes {dimension_semantics = [#tpu.dimension_semantics<parallel>], iteration_bounds = array<i64: 2>, scalar_prefetch = 0 : i64, scratch_operands = 0 : i64, tpu.core_type = #tpu.core_type<tc>, window_params = [{transform_indices = @transform_0, window_bounds = array<i64: 32, 4>}, {pipeline_mode = #tpu.pipeline_mode<synchronous>, transform_indices = @transform_1, window_bounds = array<i64: 4, 640>}, {pipeline_mode = #tpu.pipeline_mode<synchronous>, transform_indices = @transform_2, window_bounds = array<i64: 1, 640>}, {pipeline_mode = #tpu.pipeline_mode<synchronous>, transform_indices = @transform_3, window_bounds = array<i64: 128, 640>}, {pipeline_mode = #tpu.pipeline_mode<synchronous>, transform_indices = @transform_4, window_bounds = array<i64: 1, 640>}, {pipeline_mode = #tpu.pipeline_mode<synchronous>, transform_indices = @transform_5, window_bounds = array<i64: 128, 128>}, {pipeline_mode = #tpu.pipeline_mode<synchronous>, transform_indices = @transform_6, window_bounds = array<i64: 1, 128>}, {transform_indices = @transform_7, window_bounds = array<i64: 32, 128>}]} {
    %c0 = arith.constant 0 : index
    %c0_0 = arith.constant 0 : index
    %0 = vector.load %arg1[%c0, %c0_0] : memref<32x4xf32, #tpu.memory_space<vmem>>, vector<32x4xf32>
    %c0_1 = arith.constant 0 : index
    %c0_2 = arith.constant 0 : index
    %1 = vector.load %arg2[%c0_1, %c0_2] : memref<4x640xf32, #tpu.memory_space<vmem>>, vector<4x640xf32>
    %cst = arith.constant dense<0.000000e+00> : vector<32x640xf32>
    %2 = tpu.matmul %0, %1, %cst {dimension_numbers = #tpu.dot_dimension_numbers<[1], [0], [0], [1], [0, 0, 1, 1], [], []>} : vector<32x4xf32>, vector<4x640xf32>, vector<32x640xf32> -> vector<32x640xf32>
    %c0_3 = arith.constant 0 : index
    %c0_4 = arith.constant 0 : index
    %3 = vector.load %arg3[%c0_3, %c0_4] : memref<1x640xf32, #tpu.memory_space<vmem>>, vector<1x640xf32>
    %4 = vector.broadcast %3 : vector<1x640xf32> to vector<32x640xf32>
    %5 = arith.addf %2, %4 : vector<32x640xf32>
    %6 = vector.extract_strided_slice %5 {offsets = [0, 512], sizes = [32, 128], strides = [1, 1]} : vector<32x640xf32> to vector<32x128xf32>
    %7 = vector.extract_strided_slice %5 {offsets = [0, 0], sizes = [32, 128], strides = [1, 1]} : vector<32x640xf32> to vector<32x128xf32>
    %8 = vector.extract_strided_slice %0 {offsets = [0, 0], sizes = [32, 1], strides = [1, 1]} : vector<32x4xf32> to vector<32x1xf32>
    %9 = vector.broadcast %8 : vector<32x1xf32> to vector<32x128xf32>
    %10 = arith.mulf %7, %9 : vector<32x128xf32>
    %11 = arith.addf %6, %10 : vector<32x128xf32>
    %12 = vector.extract_strided_slice %5 {offsets = [0, 128], sizes = [32, 128], strides = [1, 1]} : vector<32x640xf32> to vector<32x128xf32>
    %13 = vector.extract_strided_slice %0 {offsets = [0, 1], sizes = [32, 1], strides = [1, 1]} : vector<32x4xf32> to vector<32x1xf32>
    %14 = vector.broadcast %13 : vector<32x1xf32> to vector<32x128xf32>
    %15 = arith.mulf %12, %14 : vector<32x128xf32>
    %16 = arith.addf %11, %15 : vector<32x128xf32>
    %17 = vector.extract_strided_slice %5 {offsets = [0, 256], sizes = [32, 128], strides = [1, 1]} : vector<32x640xf32> to vector<32x128xf32>
    %18 = vector.extract_strided_slice %0 {offsets = [0, 2], sizes = [32, 1], strides = [1, 1]} : vector<32x4xf32> to vector<32x1xf32>
    %19 = vector.broadcast %18 : vector<32x1xf32> to vector<32x128xf32>
    %20 = arith.mulf %17, %19 : vector<32x128xf32>
    %21 = arith.addf %16, %20 : vector<32x128xf32>
    %22 = vector.extract_strided_slice %5 {offsets = [0, 384], sizes = [32, 128], strides = [1, 1]} : vector<32x640xf32> to vector<32x128xf32>
    %23 = vector.extract_strided_slice %0 {offsets = [0, 3], sizes = [32, 1], strides = [1, 1]} : vector<32x4xf32> to vector<32x1xf32>
    %24 = vector.broadcast %23 : vector<32x1xf32> to vector<32x128xf32>
    %25 = arith.mulf %22, %24 : vector<32x128xf32>
    %26 = arith.addf %21, %25 : vector<32x128xf32>
    %c0_5 = arith.constant 0 : index
    %c0_6 = arith.constant 0 : index
    %27 = vector.load %arg4[%c0_5, %c0_6] : memref<128x640xf32, #tpu.memory_space<vmem>>, vector<128x640xf32>
    %cst_7 = arith.constant dense<0.000000e+00> : vector<32x640xf32>
    %28 = tpu.matmul %26, %27, %cst_7 {dimension_numbers = #tpu.dot_dimension_numbers<[1], [0], [0], [1], [0, 0, 1, 1], [], []>} : vector<32x128xf32>, vector<128x640xf32>, vector<32x640xf32> -> vector<32x640xf32>
    %c0_8 = arith.constant 0 : index
    %c0_9 = arith.constant 0 : index
    %29 = vector.load %arg5[%c0_8, %c0_9] : memref<1x640xf32, #tpu.memory_space<vmem>>, vector<1x640xf32>
    %30 = vector.broadcast %29 : vector<1x640xf32> to vector<32x640xf32>
    %31 = arith.addf %28, %30 : vector<32x640xf32>
    %32 = vector.extract_strided_slice %31 {offsets = [0, 512], sizes = [32, 128], strides = [1, 1]} : vector<32x640xf32> to vector<32x128xf32>
    %33 = vector.extract_strided_slice %31 {offsets = [0, 0], sizes = [32, 128], strides = [1, 1]} : vector<32x640xf32> to vector<32x128xf32>
    %34 = vector.extract_strided_slice %26 {offsets = [0, 0], sizes = [32, 1], strides = [1, 1]} : vector<32x128xf32> to vector<32x1xf32>
    %35 = vector.broadcast %34 : vector<32x1xf32> to vector<32x128xf32>
    %36 = arith.mulf %33, %35 : vector<32x128xf32>
    %37 = arith.addf %32, %36 : vector<32x128xf32>
    %38 = vector.extract_strided_slice %31 {offsets = [0, 128], sizes = [32, 128], strides = [1, 1]} : vector<32x640xf32> to vector<32x128xf32>
    %39 = vector.extract_strided_slice %26 {offsets = [0, 1], sizes = [32, 1], strides = [1, 1]} : vector<32x128xf32> to vector<32x1xf32>
    %40 = vector.broadcast %39 : vector<32x1xf32> to vector<32x128xf32>
    %41 = arith.mulf %38, %40 : vector<32x128xf32>
    %42 = arith.addf %37, %41 : vector<32x128xf32>
    %43 = vector.extract_strided_slice %31 {offsets = [0, 256], sizes = [32, 128], strides = [1, 1]} : vector<32x640xf32> to vector<32x128xf32>
    %44 = vector.extract_strided_slice %26 {offsets = [0, 2], sizes = [32, 1], strides = [1, 1]} : vector<32x128xf32> to vector<32x1xf32>
    %45 = vector.broadcast %44 : vector<32x1xf32> to vector<32x128xf32>
    %46 = arith.mulf %43, %45 : vector<32x128xf32>
    %47 = arith.addf %42, %46 : vector<32x128xf32>
    %48 = vector.extract_strided_slice %31 {offsets = [0, 384], sizes = [32, 128], strides = [1, 1]} : vector<32x640xf32> to vector<32x128xf32>
    %49 = vector.extract_strided_slice %26 {offsets = [0, 3], sizes = [32, 1], strides = [1, 1]} : vector<32x128xf32> to vector<32x1xf32>
    %50 = vector.broadcast %49 : vector<32x1xf32> to vector<32x128xf32>
    %51 = arith.mulf %48, %50 : vector<32x128xf32>
    %52 = arith.addf %47, %51 : vector<32x128xf32>
    %c0_10 = arith.constant 0 : index
    %c0_11 = arith.constant 0 : index
    %53 = vector.load %arg6[%c0_10, %c0_11] : memref<128x128xf32, #tpu.memory_space<vmem>>, vector<128x128xf32>
    %cst_12 = arith.constant dense<0.000000e+00> : vector<32x128xf32>
    %54 = tpu.matmul %52, %53, %cst_12 {dimension_numbers = #tpu.dot_dimension_numbers<[1], [0], [0], [1], [0, 0, 1, 1], [], []>} : vector<32x128xf32>, vector<128x128xf32>, vector<32x128xf32> -> vector<32x128xf32>
    %c0_13 = arith.constant 0 : index
    %c0_14 = arith.constant 0 : index
    %55 = vector.load %arg7[%c0_13, %c0_14] : memref<1x128xf32, #tpu.memory_space<vmem>>, vector<1x128xf32>
    %56 = vector.broadcast %55 : vector<1x128xf32> to vector<32x128xf32>
    %57 = arith.addf %54, %56 : vector<32x128xf32>
    %c0_15 = arith.constant 0 : index
    %c0_16 = arith.constant 0 : index
    %58 = vector.load %arg8[%c0_15, %c0_16] : memref<32x128xf32, #tpu.memory_space<vmem>>, vector<32x128xf32>
    tpu.vector_store %arg8[%c0_15, %c0_16], %57 {strides = array<i32>} : memref<32x128xf32, #tpu.memory_space<vmem>>, vector<32x128xf32>,
    return
  }
  func.func @transform_0(%arg0: i32) -> (i32, i32) {
    %c0_i32 = arith.constant 0 : i32
    %c0_i32_0 = arith.constant 0 : i32
    return %arg0, %c0_i32 : i32, i32
  }
  func.func @transform_1(%arg0: i32) -> (i32, i32) {
    %c0_i32 = arith.constant 0 : i32
    %c0_i32_0 = arith.constant 0 : i32
    %c0_i32_1 = arith.constant 0 : i32
    return %c0_i32, %c0_i32_0 : i32, i32
  }
  func.func @transform_2(%arg0: i32) -> (i32, i32) {
    %c0_i32 = arith.constant 0 : i32
    %c0_i32_0 = arith.constant 0 : i32
    %c0_i32_1 = arith.constant 0 : i32
    return %c0_i32, %c0_i32_0 : i32, i32
  }
  func.func @transform_3(%arg0: i32) -> (i32, i32) {
    %c0_i32 = arith.constant 0 : i32
    %c0_i32_0 = arith.constant 0 : i32
    %c0_i32_1 = arith.constant 0 : i32
    return %c0_i32, %c0_i32_0 : i32, i32
  }
  func.func @transform_4(%arg0: i32) -> (i32, i32) {
    %c0_i32 = arith.constant 0 : i32
    %c0_i32_0 = arith.constant 0 : i32
    %c0_i32_1 = arith.constant 0 : i32
    return %c0_i32, %c0_i32_0 : i32, i32
  }
  func.func @transform_5(%arg0: i32) -> (i32, i32) {
    %c0_i32 = arith.constant 0 : i32
    %c0_i32_0 = arith.constant 0 : i32
    %c0_i32_1 = arith.constant 0 : i32
    return %c0_i32, %c0_i32_0 : i32, i32
  }
  func.func @transform_6(%arg0: i32) -> (i32, i32) {
    %c0_i32 = arith.constant 0 : i32
    %c0_i32_0 = arith.constant 0 : i32
    %c0_i32_1 = arith.constant 0 : i32
    return %c0_i32, %c0_i32_0 : i32, i32
  }
  func.func @transform_7(%arg0: i32) -> (i32, i32) {
    %c0_i32 = arith.constant 0 : i32
    %c0_i32_0 = arith.constant 0 : i32
    return %arg0, %c0_i32 : i32, i32
  }
}

module attributes {stable_mosaic.version = 11 : i64} {
  func.func @kernel(%arg0: i32, %arg1: memref<32x4xf32, #tpu.memory_space<vmem>>, %arg2: memref<4x640xf32, #tpu.memory_space<vmem>>, %arg3: memref<1x640xf32, #tpu.memory_space<vmem>>, %arg4: memref<128x640xf32, #tpu.memory_space<vmem>>, %arg5: memref<1x640xf32, #tpu.memory_space<vmem>>, %arg6: memref<128x128xf32, #tpu.memory_space<vmem>>, %arg7: memref<1x128xf32, #tpu.memory_space<vmem>>, %arg8: memref<32x128xf32, #tpu.memory_space<vmem>>) attributes {dimension_semantics = [#tpu.dimension_semantics<parallel>], iteration_bounds = array<i64: 2>, scalar_prefetch = 0 : i64, scratch_operands = 0 : i64, tpu.core_type = #tpu.core_type<tc>, window_params = [{transform_indices = @transform_0, window_bounds = array<i64: 32, 4>}, {pipeline_mode = #tpu.pipeline_mode<synchronous>, transform_indices = @transform_1, window_bounds = array<i64: 4, 640>}, {pipeline_mode = #tpu.pipeline_mode<synchronous>, transform_indices = @transform_2, window_bounds = array<i64: 1, 640>}, {pipeline_mode = #tpu.pipeline_mode<synchronous>, transform_indices = @transform_3, window_bounds = array<i64: 128, 640>}, {pipeline_mode = #tpu.pipeline_mode<synchronous>, transform_indices = @transform_4, window_bounds = array<i64: 1, 640>}, {pipeline_mode = #tpu.pipeline_mode<synchronous>, transform_indices = @transform_5, window_bounds = array<i64: 128, 128>}, {pipeline_mode = #tpu.pipeline_mode<synchronous>, transform_indices = @transform_6, window_bounds = array<i64: 1, 128>}, {transform_indices = @transform_7, window_bounds = array<i64: 32, 128>}]} {
    %c0 = arith.constant 0 : index
    %c0_0 = arith.constant 0 : index
    %0 = vector.load %arg1[%c0, %c0_0] : memref<32x4xf32, #tpu.memory_space<vmem>>, vector<32x4xf32>
    %c0_1 = arith.constant 0 : index
    %c0_2 = arith.constant 0 : index
    %1 = vector.load %arg2[%c0_1, %c0_2] : memref<4x640xf32, #tpu.memory_space<vmem>>, vector<4x640xf32>
    %cst = arith.constant dense<0.000000e+00> : vector<32x640xf32>
    %2 = tpu.matmul %0, %1, %cst {dimension_numbers = #tpu.dot_dimension_numbers<[1], [0], [0], [1], [0, 0, 1, 1], [], []>} : vector<32x4xf32>, vector<4x640xf32>, vector<32x640xf32> -> vector<32x640xf32>
    %c0_3 = arith.constant 0 : index
    %c0_4 = arith.constant 0 : index
    %3 = vector.load %arg3[%c0_3, %c0_4] : memref<1x640xf32, #tpu.memory_space<vmem>>, vector<1x640xf32>
    %4 = vector.broadcast %3 : vector<1x640xf32> to vector<32x640xf32>
    %5 = arith.addf %2, %4 : vector<32x640xf32>
    %6 = vector.extract_strided_slice %5 {offsets = [0, 512], sizes = [32, 128], strides = [1, 1]} : vector<32x640xf32> to vector<32x128xf32>
    %7 = vector.extract_strided_slice %5 {offsets = [0, 0], sizes = [32, 128], strides = [1, 1]} : vector<32x640xf32> to vector<32x128xf32>
    %8 = vector.extract_strided_slice %0 {offsets = [0, 0], sizes = [32, 1], strides = [1, 1]} : vector<32x4xf32> to vector<32x1xf32>
    %9 = vector.broadcast %8 : vector<32x1xf32> to vector<32x128xf32>
    %10 = arith.mulf %7, %9 : vector<32x128xf32>
    %11 = arith.addf %6, %10 : vector<32x128xf32>
    %12 = vector.extract_strided_slice %5 {offsets = [0, 128], sizes = [32, 128], strides = [1, 1]} : vector<32x640xf32> to vector<32x128xf32>
    %13 = vector.extract_strided_slice %0 {offsets = [0, 1], sizes = [32, 1], strides = [1, 1]} : vector<32x4xf32> to vector<32x1xf32>
    %14 = vector.broadcast %13 : vector<32x1xf32> to vector<32x128xf32>
    %15 = arith.mulf %12, %14 : vector<32x128xf32>
    %16 = arith.addf %11, %15 : vector<32x128xf32>
    %17 = vector.extract_strided_slice %5 {offsets = [0, 256], sizes = [32, 128], strides = [1, 1]} : vector<32x640xf32> to vector<32x128xf32>
    %18 = vector.extract_strided_slice %0 {offsets = [0, 2], sizes = [32, 1], strides = [1, 1]} : vector<32x4xf32> to vector<32x1xf32>
    %19 = vector.broadcast %18 : vector<32x1xf32> to vector<32x128xf32>
    %20 = arith.mulf %17, %19 : vector<32x128xf32>
    %21 = arith.addf %16, %20 : vector<32x128xf32>
    %22 = vector.extract_strided_slice %5 {offsets = [0, 384], sizes = [32, 128], strides = [1, 1]} : vector<32x640xf32> to vector<32x128xf32>
    %23 = vector.extract_strided_slice %0 {offsets = [0, 3], sizes = [32, 1], strides = [1, 1]} : vector<32x4xf32> to vector<32x1xf32>
    %24 = vector.broadcast %23 : vector<32x1xf32> to vector<32x128xf32>
    %25 = arith.mulf %22, %24 : vector<32x128xf32>
    %26 = arith.addf %21, %25 : vector<32x128xf32>
    %c0_5 = arith.constant 0 : index
    %c0_6 = arith.constant 0 : index
    %27 = vector.load %arg4[%c0_5, %c0_6] : memref<128x640xf32, #tpu.memory_space<vmem>>, vector<128x640xf32>
    %cst_7 = arith.constant dense<0.000000e+00> : vector<32x640xf32>
    %28 = tpu.matmul %26, %27, %cst_7 {dimension_numbers = #tpu.dot_dimension_numbers<[1], [0], [0], [1], [0, 0, 1, 1], [], []>} : vector<32x128xf32>, vector<128x640xf32>, vector<32x640xf32> -> vector<32x640xf32>
    %c0_8 = arith.constant 0 : index
    %c0_9 = arith.constant 0 : index
    %29 = vector.load %arg5[%c0_8, %c0_9] : memref<1x640xf32, #tpu.memory_space<vmem>>, vector<1x640xf32>
    %30 = vector.broadcast %29 : vector<1x640xf32> to vector<32x640xf32>
    %31 = arith.addf %28, %30 : vector<32x640xf32>
    %32 = vector.extract_strided_slice %31 {offsets = [0, 512], sizes = [32, 128], strides = [1, 1]} : vector<32x640xf32> to vector<32x128xf32>
    %33 = vector.extract_strided_slice %31 {offsets = [0, 0], sizes = [32, 128], strides = [1, 1]} : vector<32x640xf32> to vector<32x128xf32>
    %34 = vector.extract_strided_slice %26 {offsets = [0, 0], sizes = [32, 1], strides = [1, 1]} : vector<32x128xf32> to vector<32x1xf32>
    %35 = vector.broadcast %34 : vector<32x1xf32> to vector<32x128xf32>
    %36 = arith.mulf %33, %35 : vector<32x128xf32>
    %37 = arith.addf %32, %36 : vector<32x128xf32>
    %38 = vector.extract_strided_slice %31 {offsets = [0, 128], sizes = [32, 128], strides = [1, 1]} : vector<32x640xf32> to vector<32x128xf32>
    %39 = vector.extract_strided_slice %26 {offsets = [0, 1], sizes = [32, 1], strides = [1, 1]} : vector<32x128xf32> to vector<32x1xf32>
    %40 = vector.broadcast %39 : vector<32x1xf32> to vector<32x128xf32>
    %41 = arith.mulf %38, %40 : vector<32x128xf32>
    %42 = arith.addf %37, %41 : vector<32x128xf32>
    %43 = vector.extract_strided_slice %31 {offsets = [0, 256], sizes = [32, 128], strides = [1, 1]} : vector<32x640xf32> to vector<32x128xf32>
    %44 = vector.extract_strided_slice %26 {offsets = [0, 2], sizes = [32, 1], strides = [1, 1]} : vector<32x128xf32> to vector<32x1xf32>
    %45 = vector.broadcast %44 : vector<32x1xf32> to vector<32x128xf32>
    %46 = arith.mulf %43, %45 : vector<32x128xf32>
    %47 = arith.addf %42, %46 : vector<32x128xf32>
    %48 = vector.extract_strided_slice %31 {offsets = [0, 384], sizes = [32, 128], strides = [1, 1]} : vector<32x640xf32> to vector<32x128xf32>
    %49 = vector.extract_strided_slice %26 {offsets = [0, 3], sizes = [32, 1], strides = [1, 1]} : vector<32x128xf32> to vector<32x1xf32>
    %50 = vector.broadcast %49 : vector<32x1xf32> to vector<32x128xf32>
    %51 = arith.mulf %48, %50 : vector<32x128xf32>
    %52 = arith.addf %47, %51 : vector<32x128xf32>
    %c0_10 = arith.constant 0 : index
    %c0_11 = arith.constant 0 : index
    %53 = vector.load %arg6[%c0_10, %c0_11] : memref<128x128xf32, #tpu.memory_space<vmem>>, vector<128x128xf32>
    %cst_12 = arith.constant dense<0.000000e+00> : vector<32x128xf32>
    %54 = tpu.matmul %52, %53, %cst_12 {dimension_numbers = #tpu.dot_dimension_numbers<[1], [0], [0], [1], [0, 0, 1, 1], [], []>} : vector<32x128xf32>, vector<128x128xf32>, vector<32x128xf32> -> vector<32x128xf32>
    %c0_13 = arith.constant 0 : index
    %c0_14 = arith.constant 0 : index
    %55 = vector.load %arg7[%c0_13, %c0_14] : memref<1x128xf32, #tpu.memory_space<vmem>>, vector<1x128xf32>
    %56 = vector.broadcast %55 : vector<1x128xf32> to vector<32x128xf32>
    %57 = arith.addf %54, %56 : vector<32x128xf32>
    %c0_15 = arith.constant 0 : index
    %c0_16 = arith.constant 0 : index
    %58 = vector.load %arg8[%c0_15, %c0_16] : memref<32x128xf32, #tpu.memory_space<vmem>>, vector<32x128xf32>
    tpu.vector_store %arg8[%c0_15, %c0_16], %57 {strides = array<i32>} : memref<32x128xf32, #tpu.memory_space<vmem>>, vector<32x128xf32>,
    return
  }
  func.func @transform_0(%arg0: i32) -> (i32, i32) {
    %c0_i32 = arith.constant 0 : i32
    %c0_i32_0 = arith.constant 0 : i32
    return %arg0, %c0_i32 : i32, i32
  }
  func.func @transform_1(%arg0: i32) -> (i32, i32) {
    %c0_i32 = arith.constant 0 : i32
    %c0_i32_0 = arith.constant 0 : i32
    %c0_i32_1 = arith.constant 0 : i32
    return %c0_i32, %c0_i32_0 : i32, i32
  }
  func.func @transform_2(%arg0: i32) -> (i32, i32) {
    %c0_i32 = arith.constant 0 : i32
    %c0_i32_0 = arith.constant 0 : i32
    %c0_i32_1 = arith.constant 0 : i32
    return %c0_i32, %c0_i32_0 : i32, i32
  }
  func.func @transform_3(%arg0: i32) -> (i32, i32) {
    %c0_i32 = arith.constant 0 : i32
    %c0_i32_0 = arith.constant 0 : i32
    %c0_i32_1 = arith.constant 0 : i32
    return %c0_i32, %c0_i32_0 : i32, i32
  }
  func.func @transform_4(%arg0: i32) -> (i32, i32) {
    %c0_i32 = arith.constant 0 : i32
    %c0_i32_0 = arith.constant 0 : i32
    %c0_i32_1 = arith.constant 0 : i32
    return %c0_i32, %c0_i32_0 : i32, i32
  }
  func.func @transform_5(%arg0: i32) -> (i32, i32) {
    %c0_i32 = arith.constant 0 : i32
    %c0_i32_0 = arith.constant 0 : i32
    %c0_i32_1 = arith.constant 0 : i32
    return %c0_i32, %c0_i32_0 : i32, i32
  }
  func.func @transform_6(%arg0: i32) -> (i32, i32) {
    %c0_i32 = arith.constant 0 : i32
    %c0_i32_0 = arith.constant 0 : i32
    %c0_i32_1 = arith.constant 0 : i32
    return %c0_i32, %c0_i32_0 : i32, i32
  }
  func.func @transform_7(%arg0: i32) -> (i32, i32) {
    %c0_i32 = arith.constant 0 : i32
    %c0_i32_0 = arith.constant 0 : i32
    return %arg0, %c0_i32 : i32, i32
  }
}

</mosaic_0001>

<bundles_post_ra>
// kernel: tpu_custom_call.1
= control target key start
LH: loop header
LB: loop body
LE: loop exit
PB: predicated region body
PF: predicated region fallthrough
CT: control target
= control target key end

     0   :  { %12 = vsyncpa [#allocation3], 0  ;;  %s2350_s0 = inlined_call_operand.vmem [shape: f32[64,4], index: 0, kind: input, shape index: {}]   ;;  %s2351_s1 = inlined_call_operand.vmem [shape: f32[4,640], index: 1, kind: input, shape index: {}]   ;;  %s2352_s2 = inlined_call_operand.vmem [shape: f32[1,640], index: 2, kind: input, shape index: {}]   ;;  %s2353_s3 = inlined_call_operand.hbm [shape: f32[128,640], index: 3, kind: input, shape index: {}]   ;;  %s2354_s4 = inlined_call_operand.vmem [shape: f32[1,640], index: 4, kind: input, shape index: {}]   ;;  %s2355_s5 = inlined_call_operand.hbm [shape: f32[128,128], index: 5, kind: input, shape index: {}]   ;;  %s2356_s6 = inlined_call_operand.vmem [shape: f32[1,128], index: 6, kind: input, shape index: {}]   ;;  %s2357_s7 = inlined_call_operand.hbm [shape: f32[64,128], index: 7, kind: output, shape index: {}]  }
   0x1   :  { %13 = vsyncpa [#allocation6], 0 }
   0x2   :  { %14 = vsyncpa [#allocation4], 0 }
   0x3   :  { %16 = vsyncpa [#allocation4 + $0x1], 0  ;;  %s1990_s24 = smov 0   ;;  %s1992_s25 = smov 0  }
   0x4   :  { %s1994_s26 = smov 0   ;;  %s1996_s27 = smov 0  }
   0x5 LB: > { %s2011_s28 = sadd.s32 4294967295, %s1934_s27   ;;  %s1412_s29 = sadd.s32 4294967294, %s1934_s27   ;;  %s1934_s27 = sphi %s1996_s27, %s2377_s27   ;;  %s1930_s26 = sphi %s1994_s26, %s2376_s26   ;;  %s1926_s25 = sphi %s1992_s25, %s2375_s25   ;;  %s1922_s24 = sphi %s1990_s24, %s2374_s24  }
   0x6   : > { %s2015_s30 = sadd.s32 1, %s1934_s27   ;;  %s181_s8 = sadd.s32 1, %s1930_s26 }
   0x7   : > { %s178_s9 = ssub.s32 %s1934_s27, %s2015_s30  ;;  %p191_p0 = scmp.ne.s32.totalorder %s1930_s26, %s1926_s25 }
   0x8   : > { %p179_p1 = scmp.eq.s32.totalorder %s178_s9, 0  ;;  %p192_p2 = scmp.eq.s32.totalorder %s2011_s28, 1 }
   0x9   : > { %p197_p3 = scmp.ne.s32.totalorder %s1926_s25, %s1922_s24  ;;  %p198_p4 = scmp.eq.s32.totalorder %s1412_s29, 1 }
   0xa   : > { %s2026_s10 = scalar_select %p179_p1, %s1930_s26, %s181_s8  }
   0xb   : > { %p2028_p5 = por %p192_p2, %p191_p0  ;;  %p2032_p6 = por %p198_p4, %p197_p3 }
   0xc   : > { %2361 = sst [smem:[#allocation11_spill]] %s2026_s10  ;;  %p1413_p7 = scmp.ge.s32.totalorder %s1934_s27, 1 }
   0xd   : > { %s2362_s11 = scalar_select %p2028_p5, 1, 0 }
   0xe   : > { %s2363_s12 = scalar_select %p2032_p6, 1, 0 }
   0xf   : > { %p205_p8 = scmp.lt.s32.totalorder %s1934_s27, 3  ;;  %p2358_p9 = scmp.eq.s32.totalorder %s2011_s28, 0 }
  0x10   : > { %s1936_s14 = smov [#allocation2]   ;;  %s1937_s17 = smov [#allocation5]  }
  0x11   : > { %p2039_p10 = pnand %p1413_p7, %p205_p8  ;;  %s223_s15 = sshll.u32 %s1936_s14, 4  ;;  %s224_s15 = int_to_ptr.vmem [resolvable:$true] %s223_s15 }
  0x12   : > { %s239_s18 = sshll.u32 %s1937_s17, 4  ;;  %s1808_s21 = scalar_lea.hbm %s2353_s3, 10240  ;;  %s2051_s18 = int_to_ptr.vmem [resolvable:$true] %s239_s18 }
  0x13   : > { %s2364_s13 = scalar_select %p2039_p10, 1, 0 }
  0x14   : > { %p1716_p11 = pneg %p2039_p10  ;;  %p1809_p13 = scmp.ne.s32.totalorder %s2353_s3, %s1808_s21 }
  0x15   : > { %p1815_p3 = scmp.lt.u32.totalorder %s1808_s21, %s2353_s3 }
  0x16   : > { %p2047_p12 = pnand %p2358_p9, %p1716_p11 }
  0x18   : > { %p1810_p0 = pneg %p2047_p12 }
  0x1a   : > { %p1811_p1 = pnand %p1810_p0, %p1809_p13 }
  0x1c   : > { %p1812_p2 = pneg %p1811_p1 }
  0x1e   : > { %p1817_p4 = pnand %p1815_p3, %p1812_p2 }
  0x20   : > { %1820 = shalt.err (!%p1817_p4)
}
  0x21   : > { %s1821_s9 = scalar_lea.vmem %s224_s15, 10240  ;;  %p1829_p9 = scmp.lt.s32.totalorder %s224_s15, %s224_s15 }
  0x22   : > { %p1822_p7 = scmp.ne.s32.totalorder %s224_s15, %s1821_s9  ;;  %p1830_p6 = scmp.lt.s32.totalorder %s1821_s9, %s1821_s9 }
  0x24   : > { %p1824_p8 = pnand %p1822_p7, %p1810_p0  ;;  %p1831_p5 = por %p1830_p6, %p1829_p9 }
  0x26   : > { %p1825_p11 = pneg %p1824_p8 }
  0x28   : > { %p1832_p10 = pnand %p1831_p5, %p1825_p11 }
  0x2a   : > { %1835 = shalt.err (!%p1832_p10)
}
  0x2b   : > { %s1938_s14 = smov 640   ;;  %s1939_s17 = smov 40  }
  0x2c   : > { %1719 = dma.hbm_to_vmem [thread:$0]  (!%p2047_p12), %s2353_s3, 10240, %s224_s15, [#allocation3], %s1938_s14, %s1938_s14, %s1939_s17  }
  0x2d   : > { %s1836_s23 = scalar_lea.hbm %s2355_s5, 2048 }
  0x2e   : > { %p1837_p13 = scmp.ne.s32.totalorder %s2355_s5, %s1836_s23  ;;  %p1843_p9 = scmp.lt.u32.totalorder %s1836_s23, %s2355_s5 }
  0x30   : > { %p1839_p5 = pnand %p1837_p13, %p1810_p0 }
  0x32   : > { %p1840_p6 = pneg %p1839_p5 }
  0x34   : > { %p1845_p10 = pnand %p1843_p9, %p1840_p6 }
  0x36   : > { %1848 = shalt.err (!%p1845_p10)
}
  0x37   : > { %s1849_s15 = scalar_lea.vmem %s2051_s18, 2048  ;;  %p1857_p4 = scmp.lt.s32.totalorder %s2051_s18, %s2051_s18 }
  0x38   : > { %p1850_p1 = scmp.ne.s32.totalorder %s2051_s18, %s1849_s15  ;;  %p1858_p7 = scmp.lt.s32.totalorder %s1849_s15, %s1849_s15 }
  0x3a   : > { %p1852_p2 = pnand %p1850_p1, %p1810_p0  ;;  %p1859_p8 = por %p1858_p7, %p1857_p4 }
  0x3c   : > { %p1853_p3 = pneg %p1852_p2 }
  0x3e   : > { %p1860_p11 = pnand %p1859_p8, %p1853_p3 }
  0x40   : > { %1863 = shalt.err (!%p1860_p11)
}
  0x41   : > { %s1940_s10 = smov 128   ;;  %s1941_s14 = smov 8  }
  0x42   : > { %1722 = dma.hbm_to_vmem [thread:$0]  (!%p2047_p12), %s2355_s5, 2048, %s2051_s18, [#allocation6], %s1940_s10, %s1940_s10, %s1941_s14  }
  0x43   : > { %p2366_p13 = scmp.ne.s32.totalorder %s2364_s13, 0 }
  0x44   : > { %p2367_p0 = scmp.eq.s32.totalorder (!%p2366_p13), %s2011_s28, 0 }
  0x45   : > { %267 = sbr.rel (%p2366_p13) target bundleno = 811 (0x32b), region = 48 }
  0x4c   : > { %1909 = dma.done.wait (%p2367_p0), [#allocation3], 10240   ;;  %p2368_p5 = pmov %p2367_p0 }
  0x4d   : > { %p2369_p6 = pmov %p2367_p0 }
  0x4e   : > { %1911 = vsyncadd (%p2368_p5), [#allocation3], 4294957056 }
  0x4f   : > { %1913 = dma.done.wait (%p2369_p6), [#allocation6], 2048   ;;  %p2370_p9 = pmov %p2367_p0 }
  0x50   : > { %s1421_s16 = sshll.u32 %s2011_s28, 2  ;;  %v1942_v0 = vmov 0.0   ;;  %v1943_v1 = vmov 2   ;;  %v1944_v2 = vmov 0   ;;  %v314_v3 = vld [vmem:[%s2351_s1] sm:$0xff]  ;;  %vm362_vm0 = vcmask 1043456  }
  0x51   : > { %1915 = vsyncadd (%p2370_p9), [#allocation6], 4294965248  ;;  %437 = vmatprep.mubr.f32.mxu0 %v1942_v0  ;;  %449 = vmatprep.mubr.f32.mxu1 %v1942_v0  ;;  %p304_p12 = scmp.lt.s32.totalorder %s1421_s16, 7  ;;  %v347_v5 = vcombine.high %v314_v3, %v314_v3  ;;  %v315_v6 = vld [vmem:[%s2351_s1 + $0x8] sm:$0xff]  ;;  %vm349_vm1 = vcmask 31744   ;;  %v1945_v12 = vmov 3  }
  0x52   : > { %1779 = vset.pattern.permute.xlu1 %v1943_v1  ;;  %1777 = vset.pattern.permute.xlu0 %v1944_v2  ;;  %v316_v8 = vld [vmem:[%s2351_s1 + $0x10] sm:$0xf]  ;;  %v348_v9 = vcombine.high %v315_v6, %v315_v6  ;;  %v733_v13 = vld [vmem:[#allocation2 + $0x8] sm:$0xff]  ;;  %v732_v15 = vld [vmem:[#allocation2] sm:$0xff]  ;;  %v1946_v17 = vmov 1   ;;  %s1446_s23 = sshll.u32 %s2011_s28, 9 }
  0x53   : > { %s2379_s16 = smov (!%p304_p12, %s1421_s16), 7  ;;  %1423 = vmatprep.subr.msk.mxu0 %vm362_vm0, %v347_v5  ;;  %1704 = vmatprep.subr.msk.mxu1 %vm362_vm0, %v347_v5  ;;  %v738_v14 = vld [vmem:[#allocation2 + $0x30] sm:$0xff]  ;;  %v737_v16 = vld [vmem:[#allocation2 + $0x28] sm:$0xff]  ;;  %v735_v19 = vld [vmem:[#allocation2 + $0x18] sm:$0xff]  ;;  %s2307_s9 = scalar_lea.hbm %s2357_s7, %s1446_s23 }
  0x54   : > { %s1422_s13 = sshll.u32 %s2379_s16, 3  ;;  %1424 = vmatpush1.msk.msra.mxu0 %vm362_vm0, %v314_v3  ;;  %1705 = vmatpush1.msk.msra.mxu1 %vm362_vm0, %v314_v3  ;;  %v1576_v18 = vpack.c.bf16 %v738_v14, %v733_v13  ;;  %v740_v20 = vld [vmem:[#allocation2 + $0x40] sm:$0xff]  ;;  %v734_v21 = vld [vmem:[#allocation2 + $0x10] sm:$0xff]  ;;  %v739_v22 = vld [vmem:[#allocation2 + $0x38] sm:$0xff]  ;;  %v1578_v23 = vpack.c.bf16 %v737_v16, %v732_v15  ;;  %s300_s16 = sand.u32 1, %s1926_s25  }
  0x55   : > { %s307_s21 = scalar_lea.vmem %s2350_s0, %s1422_s13  ;;  %1492 = vmatprep.subr.msk.mxu0 %vm362_vm0, %v316_v8  ;;  %1429 = vmatprep.subr.msk.mxu1 %vm362_vm0, %v348_v9  ;;  %v1608_v24 = vpack.c.bf16 %v740_v20, %v735_v19  ;;  %v743_v25 = vld [vmem:[#allocation2 + $0x58] sm:$0xff]  ;;  %v748_v26 = vld [vmem:[#allocation2 + $0x80] sm:$0xff]  ;;  %v742_v27 = vld [vmem:[#allocation2 + $0x50] sm:$0xff]  ;;  %v1610_v28 = vpack.c.bf16 %v739_v22, %v734_v21  ;;  %s1420_s13 = sshll.u32 %s300_s16, 5 }
  0x56   : > { %v310_v4 = vld [vmem:[%s307_s21] sm:$0xff]  ;;  %v2124_v7 = vld [vmem:[%s307_s21 + $0x10] sm:$0xff]  ;;  %v2138_v10 = vld [vmem:[%s307_s21 + $0x8] sm:$0xff]  ;;  %v1580_v32 = vpack.c.bf16 %v748_v26, %v743_v25  ;;  %s2309_s15 = scalar_lea.sflag [#allocation4], %s300_s16  ;;  %p2371_p1 = scmp.ne.s32.totalorder %s2362_s11, 0 }
  0x57   : > { %685 = vperm.xlu1 %1779, %v310_v4   ;;  %637 = vperm.xlu0 %1777, %v310_v4   ;;  %v2140_v11 = vld [vmem:[%s307_s21 + $0x18] sm:$0xff]  ;;  %v745_v30 = vld [vmem:[#allocation2 + $0x68] sm:$0xff]  ;;  %v750_v31 = vld [vmem:[#allocation2 + $0x90] sm:$0xff]  ;;  %s302_s21 = scalar_lea.vmem [#allocation7], %s1420_s13  ;;  %s1947_s10 = smov [#allocation7]  }
  0x58   : > { %1425 = vmatmul.mubr.msk.f32.vlgmr.msra.gmra.mrb[0].mxu0 %vm349_vm1, %v310_v4  ;;  %1427 = vmatmul.mubr.msk.f32.vlgmr.msra.gmra.mrb[0].mxu1 %vm349_vm1, %v2124_v7  ;;  %v747_v29 = vld [vmem:[#allocation2 + $0x78] sm:$0xff]  ;;  %v744_v34 = vld [vmem:[#allocation2 + $0x60] sm:$0xff]  ;;  %v749_v35 = vld [vmem:[#allocation2 + $0x88] sm:$0xff]  ;;  %v1612_v36 = vpack.c.bf16 %v750_v31, %v745_v30  ;;  %s1328_s22 = sshll.u32 %s302_s21, 4  ;;  %s1868_s14 = sshll.u32 %s1947_s10, 4  ;;  %s2302_s22 = int_to_ptr.vmem [resolvable:$true] %s1328_s22  ;;  %s1869_s14 = int_to_ptr.vmem [resolvable:$false] %s1868_s14 }
  0x59   : > { %443 = vmatprep.mubr.f32.mxu0 %v1942_v0  ;;  %1493 = vmatpush3.msk.msra.mxu0 %vm362_vm0, %v316_v8  ;;  %v1582_v33 = vpack.c.bf16 %v747_v29, %v742_v27  ;;  %v753_v37 = vld [vmem:[#allocation2 + $0xa8] sm:$0xff]  ;;  %v758_v38 = vld [vmem:[#allocation2 + $0xd0] sm:$0xff]  ;;  %v752_v39 = vld [vmem:[#allocation2 + $0xa0] sm:$0xff]  ;;  %v1614_v43 = vpack.c.bf16 %v749_v35, %v744_v34  ;;  %s1864_s28 = scalar_lea.vmem %s2302_s22, 512  ;;  %s1870_s17 = scalar_lea.vmem %s1869_s14, 1024 }
  0x5a   : > { %455 = vmatprep.mubr.f32.mxu1 %v1942_v0  ;;  %1430 = vmatpush1.msk.msra.mxu1 %vm362_vm0, %v315_v6  ;;  %v757_v40 = vld [vmem:[#allocation2 + $0xc8] sm:$0xff]  ;;  %v755_v41 = vld [vmem:[#allocation2 + $0xb8] sm:$0xff]  ;;  %v760_v42 = vld [vmem:[#allocation2 + $0xe0] sm:$0xff]  ;;  %v1584_v44 = vpack.c.bf16 %v758_v38, %v753_v37  ;;  %p1865_p10 = scmp.ne.s32.totalorder %s2302_s22, %s1864_s28  ;;  %p1871_p4 = scmp.lt.s32.totalorder %s2302_s22, %s1869_s14 }
  0x5b   : > { %1780 = vset.pattern.permute.xlu1 %v1945_v12  ;;  %1778 = vset.pattern.permute.xlu0 %v1946_v17  ;;  %v1586_v45 = vpack.c.bf16 %v757_v40, %v752_v39  ;;  %v1616_v46 = vpack.c.bf16 %v760_v42, %v755_v41  ;;  %v754_v47 = vld [vmem:[#allocation2 + $0xb0] sm:$0xff]  ;;  %v759_v48 = vld [vmem:[#allocation2 + $0xd8] sm:$0xff]  ;;  %v768_v50 = vld [vmem:[#allocation2 + $0x120] sm:$0xff]  ;;  %p1872_p7 = scmp.lt.s32.totalorder %s1870_s17, %s1864_s28 }
  0x5c   : > { %1426 = vmatmul.mubr.msk.f32.gmra.mrb[2].mxu0 %vm349_vm1, %v2138_v10  ;;  %1428 = vmatmul.mubr.msk.f32.gmra.mrb[2].mxu1 %vm349_vm1, %v2140_v11  ;;  %v763_v49 = vld [vmem:[#allocation2 + $0xf8] sm:$0xff]  ;;  %v1618_v52 = vpack.c.bf16 %v759_v48, %v754_v47  ;;  %v762_v53 = vld [vmem:[#allocation2 + $0xf0] sm:$0xff]  ;;  %v765_v55 = vld [vmem:[#allocation2 + $0x108] sm:$0xff]  ;;  %p1866_p2 = pnand %p1865_p10, %p2371_p1 }
  0x5d   : > { %526 = vmatprep.mubr.f32.mxu1 %v1942_v0  ;;  %1494 = vmatprep.mubr.msk.f32.mxu0 %vm349_vm1, %v310_v4  ;;  %v1588_v51 = vpack.c.bf16 %v768_v50, %v763_v49  ;;  %v767_v54 = vld [vmem:[#allocation2 + $0x118] sm:$0xff]  ;;  %v770_v57 = vld [vmem:[#allocation2 + $0x130] sm:$0xff]  ;;  %v764_v58 = vld [vmem:[#allocation2 + $0x100] sm:$0xff]  ;;  %p1873_p8 = por %p1872_p7, %p1871_p4 }
  0x5e   : > { %709 = vperm.xlu1 %1780, %v310_v4   ;;  %661 = vperm.xlu0 %1778, %v310_v4   ;;  %v1590_v56 = vpack.c.bf16 %v767_v54, %v762_v53  ;;  %v769_v59 = vld [vmem:[#allocation2 + $0x128] sm:$0xff]  ;;  %v1620_v60 = vpack.c.bf16 %v770_v57, %v765_v55  ;;  %v778_v63 = vld [vmem:[#allocation2 + $0x170] sm:$0xff]  ;;  %v775_v6 = vld [vmem:[#allocation2 + $0x158] sm:$0xff]  ;;  %p1867_p3 = pneg %p1866_p2 }
  0x5f   : > { %1577 = vmatprep.subr.bf16.mxu1 %v1576_v18  ;;  %1609 = vmatprep.subr.bf16.mxu0 %v1608_v24  ;;  %v1622_v61 = vpack.c.bf16 %v769_v59, %v764_v58  ;;  %v773_v62 = vld [vmem:[#allocation2 + $0x148] sm:$0xff]  ;;  %v780_v8 = vld [vmem:[#allocation2 + $0x180] sm:$0xff]  ;;  %v774_v9 = vld [vmem:[#allocation2 + $0x150] sm:$0xff]  ;;  %v319_v59 = vlaneseq }
  0x60   : > { %1431 = vmatmul.mubr.msk.f32.vlgmr.msra.gmra.mrb[4].mxu1 %vm349_vm1, %v310_v4  ;;  %1495 = vmatmul.mubr.msk.f32.vlgmr.msra.gmra.mrb[4].mxu0 %vm349_vm1, %v2138_v10  ;;  %v1592_v3 = vpack.c.bf16 %v778_v63, %v773_v62  ;;  %v772_v4 = vld [vmem:[#allocation2 + $0x140] sm:$0xff]  ;;  %v777_v5 = vld [vmem:[#allocation2 + $0x168] sm:$0xff]  ;;  %v783_v14 = vld [vmem:[#allocation2 + $0x198] sm:$0xff]  ;;  %p1874_p11 = pnand %p1873_p8, %p1867_p3 }
  0x61   : > { %532 = vmatprep.mubr.f32.mxu1 %v1942_v0  ;;  %1497 = vmatprep.mubr.msk.f32.mxu0 %vm349_vm1, %v2124_v7  ;;  %v788_v15 = vld [vmem:[#allocation2 + $0x1c0] sm:$0xff]  ;;  %v782_v18 = vld [vmem:[#allocation2 + $0x190] sm:$0xff]  ;;  %v787_v19 = vld [vmem:[#allocation2 + $0x1b8] sm:$0xff]  ;;  %v2205_v62 = vshrl.u32 %v319_v59, 7 }
  0x62   : > { %1781 = vset.pattern.permute.xlu1 %v1944_v2  ;;  %1579 = vmatpush1.bf16.msra.mxu1 %v1578_v23  ;;  %v1596_v16 = vpack.c.bf16 %v788_v15, %v783_v14  ;;  %v785_v20 = vld [vmem:[#allocation2 + $0x1a8] sm:$0xff]  ;;  %v1598_v21 = vpack.c.bf16 %v787_v19, %v782_v18  ;;  %v790_v22 = vld [vmem:[#allocation2 + $0x1d0] sm:$0xff]  ;;  %v784_v23 = vld [vmem:[#allocation2 + $0x1a0] sm:$0xff] }
  0x63   : > { %641 = vperm.xlu1 %1781, %v2138_v10   ;;  %665 = vperm.xlu0 %1778, %v2138_v10   ;;  %v789_v24 = vld [vmem:[#allocation2 + $0x1c8] sm:$0xff]  ;;  %v1628_v25 = vpack.c.bf16 %v790_v22, %v785_v20  ;;  %v792_v30 = vld [vmem:[#allocation2 + $0x1e0] sm:$0xff]  ;;  %v794_v35 = vld [vmem:[#allocation2 + $0x1f0] sm:$0xff]  ;;  %v329_v14 = vsub.s32 2, %v2205_v62 }
  0x64   : > { %1432 = vmatmul.mubr.msk.f32.gmra.mrb[6].mxu1 %vm349_vm1, %v2138_v10  ;;  %1498 = vmatmul.mubr.msk.f32.gmra.mrb[6].mxu0 %vm349_vm1, %v2140_v11  ;;  %v1630_v26 = vpack.c.bf16 %v789_v24, %v784_v23  ;;  %v793_v27 = vld [vmem:[#allocation2 + $0x1e8] sm:$0xff]  ;;  %v800_v34 = vld [vmem:[#allocation2 + $0x220] sm:$0xff]  ;;  %v803_v39 = vld [vmem:[#allocation2 + $0x238] sm:$0xff] }
  0x65   : > { %538 = vmatprep.mubr.f32.mxu1 %v1942_v0  ;;  %1611 = vmatpush1.bf16.msra.mxu0 %v1610_v28  ;;  %v798_v28 = vld [vmem:[#allocation2 + $0x210] sm:$0xff]  ;;  %v797_v31 = vld [vmem:[#allocation2 + $0x208] sm:$0xff]  ;;  %v808_v40 = vld [vmem:[#allocation2 + $0x260] sm:$0xff] }
  0x66   : > { %1581 = vmatprep.subr.bf16.mxu1 %v1580_v32  ;;  %1613 = vmatprep.subr.bf16.mxu0 %v1612_v36  ;;  %v1600_v29 = vpack.c.bf16 %v798_v28, %v793_v27  ;;  %v795_v32 = vld [vmem:[#allocation2 + $0x1f8] sm:$0xff]  ;;  %v1604_v41 = vpack.c.bf16 %v808_v40, %v803_v39  ;;  %v802_v42 = vld [vmem:[#allocation2 + $0x230] sm:$0xff]  ;;  %v804_v47 = vld [vmem:[#allocation2 + $0x240] sm:$0xff] }
  0x67   : > { %645 = vperm.xlu1 %1781, %v2124_v7   ;;  %1583 = vmatpush1.bf16.msra.mxu1 %v1582_v33  ;;  %v1602_v33 = vpack.c.bf16 %v797_v31, %v792_v30  ;;  %v799_v36 = vld [vmem:[#allocation2 + $0x218] sm:$0xff]  ;;  %v1632_v37 = vpack.c.bf16 %v800_v34, %v795_v32  ;;  %v809_v48 = vld [vmem:[#allocation2 + $0x268] sm:$0xff] }
  0x68   : > { %1433 = vmatmul.mubr.msk.f32.gmra.mrb[8].mxu1 %vm349_vm1, %v2124_v7  ;;  %1782 = vset.pattern.permute.xlu0 %v1943_v1  ;;  %v1634_v38 = vpack.c.bf16 %v799_v36, %v794_v35  ;;  %v1638_v50 = vpack.c.bf16 %v809_v48, %v804_v47 }
  0x69   : > { %544 = vmatprep.mubr.f32.mxu1 %v1942_v0  ;;  %689 = vperm.xlu0 %1782, %v2138_v10  }
  0x6a   : > { %1615 = vmatpush1.bf16.msra.mxu0 %v1614_v43  ;;  %1585 = vmatprep.subr.bf16.mxu1 %v1584_v44  ;;  %v807_v43 = vld [vmem:[#allocation2 + $0x258] sm:$0xff]  ;;  %v805_v44 = vld [vmem:[#allocation2 + $0x248] sm:$0xff] }
  0x6b   : > { %1783 = vset.pattern.permute.xlu1 %v1946_v17  ;;  %1587 = vmatpush1.bf16.msra.mxu1 %v1586_v45  ;;  %v1606_v45 = vpack.c.bf16 %v807_v43, %v802_v42 }
  0x6c   : > { %1434 = vmatmul.mubr.msk.f32.gmra.mrb[10].mxu1 %vm349_vm1, %v2140_v11  ;;  %669 = vperm.xlu1 %1783, %v2124_v7  }
  0x6d   : > { %1617 = vmatprep.subr.bf16.mxu0 %v1616_v46  ;;  %1785 = vset.pattern.permute.xlu0 %v1944_v2  ;;  %v810_v46 = vld [vmem:[#allocation2 + $0x270] sm:$0xff] }
  0x6e   : > { %1589 = vmatprep.subr.bf16.mxu1 %v1588_v51  ;;  %649 = vperm.xlu0 %1785, %v2140_v11   ;;  %v1636_v49 = vpack.c.bf16 %v810_v46, %v805_v44  ;;  %v736_v51 = vld [vmem:[#allocation2 + $0x20] sm:$0xff] }
  0x6f   : > { %1619 = vmatpush1.bf16.msra.mxu0 %v1618_v52  ;;  %903 = vmatprep.mubr.f32.mxu1 %v1942_v0  ;;  %v741_v52 = vld [vmem:[#allocation2 + $0x48] sm:$0xff] }
  0x70   : > { %1784 = vset.pattern.permute.xlu1 %v1945_v12  ;;  %992 = vmatprep.mubr.f32.mxu0 %v1942_v0  ;;  %v2196_v53 = vpack.c.bf16 %v741_v52, %v736_v51 }
  0x71   : > { %713 = vperm.xlu1 %1784, %v2138_v10   ;;  %1591 = vmatpush1.bf16.msra.mxu1 %v1590_v56  ;;  %v779_v10 = vld [vmem:[#allocation2 + $0x178] sm:$0xff] }
  0x72   : > { %1788 = vset.pattern.permute.xlu0 %v1945_v12  ;;  %1621 = vmatprep.subr.bf16.mxu0 %v1620_v60  ;;  %v1626_v13 = vpack.c.bf16 %v779_v10, %v774_v9 }
  0x73   : > { %717 = vperm.xlu0 %1788, %v2124_v7   ;;  %1623 = vmatpush1.bf16.msra.mxu0 %v1622_v61 }
  0x74   : > { %1593 = vmatprep.subr.bf16.mxu1 %v1592_v3 }
  0x75   : > { %1786 = vset.pattern.permute.xlu1 %v1943_v1 }
  0x76   : > { %693 = vperm.xlu1 %1786, %v2124_v7   ;;  %v1594_v7 = vpack.c.bf16 %v777_v5, %v772_v4  ;;  %v321_v4 = vsub.s32 0, %v2205_v62  ;;  %v317_v5 = vld [vmem:[%s2352_s2] sm:$0x1f] }
  0x77   : > { %1791 = vset.pattern.permute.xlu0 %v1944_v2  ;;  %v2227_v27 = vrot.slane %v317_v5, %v329_v14 }
  0x78   : > { %1595 = vmatpush1.bf16.msra.mxu1 %v1594_v7  ;;  %v325_v7 = vsub.s32 1, %v2205_v62 }
  0x79   : > { %1597 = vmatprep.subr.bf16.mxu1 %v1596_v16 }
  0x7a   : > { %1787 = vset.pattern.permute.xlu1 %v1946_v17  ;;  %v326_v18 = vrot.slane %v317_v5, %v325_v7 }
  0x7b   : > { %673 = vperm.xlu1 %1787, %v2140_v11  }
  0x7c   : > { %1599 = vmatpush1.bf16.msra.mxu1 %v1598_v21  ;;  %v333_v21 = vsub.s32 3, %v2205_v62 }
  0x7d   : > { %1601 = vmatprep.subr.bf16.mxu1 %v1600_v29 }
  0x7f   : > { %1789 = vset.pattern.permute.xlu1 %v1943_v1 }
  0x80   : > { %697 = vperm.xlu1 %1789, %v2140_v11   ;;  %1603 = vmatpush1.bf16.msra.mxu1 %v1602_v33  ;;  %v2231_v33 = vrot.slane %v317_v5, %v333_v21 }
  0x81   : > { %1605 = vmatprep.subr.bf16.mxu1 %v1604_v41 }
  0x84   : > { %1790 = vset.pattern.permute.xlu1 %v1945_v12  ;;  %1607 = vmatpush1.bf16.msra.mxu1 %v1606_v45 }
  0x85   : > { %721 = vperm.xlu1 %1790, %v2140_v11   ;;  %v1624_v11 = vpack.c.bf16 %v780_v8, %v775_v6  ;;  %1641 = vmatprep.subr.bf16.mxu1 %v2196_v53 }
  0x87   : > { %1625 = vmatprep.subr.bf16.mxu0 %v1624_v11  ;;  %v337_v11 = vsub.s32 4, %v2205_v62 }
  0x88   : > { %1627 = vmatpush1.bf16.msra.mxu0 %v1626_v13  ;;  %v322_v13 = vrot.slane %v317_v5, %v321_v4 }
  0x89   : > { %1792 = vset.pattern.permute.xlu1 %v1946_v17  ;;  %1629 = vmatprep.subr.bf16.mxu0 %v1628_v25  ;;  %v338_v25 = vrot.slane %v317_v5, %v337_v11 }
  0x8c   : > { %1631 = vmatpush1.bf16.msra.mxu0 %v1630_v26 }
  0x8d   : > { %1633 = vmatprep.subr.bf16.mxu0 %v1632_v37 }
  0x90   : > { %1635 = vmatpush1.bf16.msra.mxu0 %v1634_v38 }
  0x91   : > { %1637 = vmatprep.subr.bf16.mxu0 %v1636_v49 }
  0x94   : > { %1639 = vmatpush1.bf16.msra.mxu0 %v1638_v50 }
  0xd6   : > { %v2199_v54 = vpop.permute.xlu1 %685  ;;  %v638_v58 = vpop.permute.xlu0 %637 }
  0xdd   : > { %v2201_v55 = vpop.permute.xlu1 %709  ;;  %v662_v61 = vpop.permute.xlu0 %661 }
  0xe2   : > { %v642_v56 = vpop.permute.xlu1 %641  ;;  %v666_v3 = vpop.permute.xlu0 %665 }
  0xe6   : > { %v646_v57 = vpop.permute.xlu1 %645 }
  0xe8   : > { %v690_v16 = vpop.permute.xlu0 %689 }
  0xeb   : > { %v2203_v60 = vpop.permute.xlu1 %669 }
  0xed   : > { %v650_v42 = vpop.permute.xlu0 %649 }
  0xf0   : > { %v2207_v63 = vpop.permute.xlu1 %713 }
  0xf5   : > { %v2218_v15 = vpop.permute.xlu1 %693 }
  0xfa   : > { %v674_v47 = vpop.permute.xlu1 %673 }
 0x12b   : > { %v439_v6 = vpop.f32.mrb[0].mxu0  ;;  %v451_v8 = vpop.f32.mrb[0].mxu1 }
 0x12c   : > { %v441_v9 = vpop.f32.mrb[1].mxu0  ;;  %v453_v10 = vpop.f32.mrb[1].mxu1  ;;  %v440_v26 = vadd.f32 %v439_v6, %v322_v13  ;;  %v452_v30 = vadd.f32 %v451_v8, %v322_v13 }
 0x12d   : > { %v442_v29 = vadd.f32 %v441_v9, %v326_v18  ;;  %v454_v43 = vadd.f32 %v453_v10, %v326_v18 }
 0x12e   : > { %v652_v39 = vmul.f32 %v638_v58, %v440_v26  ;;  %v654_v49 = vmul.f32 %v646_v57, %v452_v30  ;;  %v746_v30 = vld [vmem:[#allocation2 + $0x70] sm:$0xff] }
 0x12f   : > { %v445_v19 = vpop.f32.mrb[2].mxu0  ;;  %v457_v20 = vpop.f32.mrb[2].mxu1  ;;  %v676_v48 = vmul.f32 %v662_v61, %v442_v29  ;;  %v678_v57 = vmul.f32 %v2203_v60, %v454_v43 }
 0x130   : > { %v446_v22 = vadd.f32 %v445_v19, %v322_v13  ;;  %v447_v23 = vpop.f32.mrb[3].mxu0  ;;  %v459_v24 = vpop.f32.mrb[3].mxu1  ;;  %v458_v35 = vadd.f32 %v457_v20, %v322_v13 }
 0x131   : > { %v448_v28 = vadd.f32 %v447_v23, %v326_v18  ;;  %v460_v45 = vadd.f32 %v459_v24, %v326_v18 }
 0x132   : > { %v653_v34 = vmul.f32 %v642_v56, %v446_v22  ;;  %v655_v5 = vmul.f32 %v650_v42, %v458_v35  ;;  %v698_v22 = vpop.permute.xlu1 %697  ;;  %v718_v35 = vpop.permute.xlu0 %717 }
 0x133   : > { %v528_v31 = vpop.f32.mrb[4].mxu1  ;;  %v1496_v32 = vpop.f32.mrb[4].mxu0  ;;  %v677_v44 = vmul.f32 %v666_v3, %v448_v28  ;;  %v679_v61 = vmul.f32 %v674_v47, %v460_v45  ;;  %v761_v45 = vld [vmem:[#allocation2 + $0xe8] sm:$0xff] }
 0x134   : > { %v623_v36 = vadd.f32 %v1496_v32, %v338_v25  ;;  %v530_v37 = vpop.f32.mrb[5].mxu1  ;;  %v617_v38 = vpop.f32.mrb[5].mxu0  ;;  %v529_v40 = vadd.f32 %v528_v31, %v2227_v27  ;;  %v751_v31 = vld [vmem:[#allocation2 + $0x98] sm:$0xff] }
 0x135   : > { %v618_v41 = vadd.f32 %v617_v38, %v338_v25  ;;  %v531_v50 = vadd.f32 %v530_v37, %v2231_v33  ;;  %v1644_v38 = vpack.c.bf16 %v751_v31, %v746_v30  ;;  %v1212_v30 = vld [vmem:[#allocation5 + $0x50] sm:$0xff]  ;;  %v1213_v31 = vld [vmem:[#allocation5 + $0x58] sm:$0xff] }
 0x136   : > { %v657_v46 = vadd.f32 %v653_v34, %v623_v36  ;;  %v700_v10 = vmul.f32 %v2199_v54, %v529_v40  ;;  %v722_v43 = vpop.permute.xlu1 %721 }
 0x137   : > { %v656_v51 = vadd.f32 %v652_v39, %v618_v41  ;;  %v534_v52 = vpop.f32.mrb[6].mxu1  ;;  %v1499_v56 = vpop.f32.mrb[6].mxu0  ;;  %v724_v23 = vmul.f32 %v2201_v55, %v531_v50 }
 0x138   : > { %v681_v59 = vadd.f32 %v677_v44, %v657_v46  ;;  %v535_v58 = vadd.f32 %v534_v52, %v2227_v27  ;;  %v633_v6 = vadd.f32 %v1499_v56, %v338_v25  ;;  %v627_v8 = vpop.f32.mrb[7].mxu0  ;;  %v536_v9 = vpop.f32.mrb[7].mxu1  ;;  %v756_v44 = vld [vmem:[#allocation2 + $0xc0] sm:$0xff]  ;;  %v781_v56 = vld [vmem:[#allocation2 + $0x188] sm:$0xff] }
 0x139   : > { %v680_v3 = vadd.f32 %v676_v48, %v656_v51  ;;  %v628_v13 = vadd.f32 %v627_v8, %v338_v25  ;;  %v537_v18 = vadd.f32 %v536_v9, %v2231_v33  ;;  %v776_v52 = vld [vmem:[#allocation2 + $0x160] sm:$0xff]  ;;  %v801_v9 = vld [vmem:[#allocation2 + $0x228] sm:$0xff] }
 0x13a   : > { %v701_v19 = vmul.f32 %v690_v16, %v535_v58  ;;  %v659_v20 = vadd.f32 %v655_v5, %v633_v6  ;;  %v791_v5 = vld [vmem:[#allocation2 + $0x1d8] sm:$0xff]  ;;  %v1656_v58 = vpack.c.bf16 %v781_v56, %v776_v52  ;;  %v796_v8 = vld [vmem:[#allocation2 + $0x200] sm:$0xff] }
 0x13b   : > { %v704_v24 = vadd.f32 %v700_v10, %v680_v3  ;;  %v658_v26 = vadd.f32 %v654_v49, %v628_v13  ;;  %v725_v28 = vmul.f32 %v2207_v63, %v537_v18  ;;  %v540_v29 = vpop.f32.mrb[8].mxu1  ;;  %v806_v10 = vld [vmem:[#allocation2 + $0x250] sm:$0xff]  ;;  %v811_v3 = vld [vmem:[#allocation2 + $0x278] sm:$0xff]  ;;  %v1203_v18 = vld [vmem:[#allocation5 + $0x8] sm:$0xff] }
 0x13c   : > { %v705_v54 = vadd.f32 %v701_v19, %v681_v59  ;;  %v683_v32 = vadd.f32 %v679_v61, %v659_v20  ;;  %v541_v25 = vadd.f32 %v540_v29, %v2227_v27  ;;  %v542_v34 = vpop.f32.mrb[9].mxu1  ;;  %v786_v59 = vld [vmem:[#allocation2 + $0x1b0] sm:$0xff]  ;;  %v1668_v13 = vpack.c.bf16 %v811_v3, %v806_v10  ;;  %v1205_v61 = vld [vmem:[#allocation5 + $0x18] sm:$0xff]  ;;  %v1206_v20 = vld [vmem:[#allocation5 + $0x20] sm:$0xff] }
 0x13d   : > { %v728_v60 = vadd.f32 %v724_v23, %v704_v24  ;;  %v682_v36 = vadd.f32 %v678_v57, %v658_v26  ;;  %v543_v16 = vadd.f32 %v542_v34, %v2231_v33  ;;  %v1660_v6 = vpack.c.bf16 %v791_v5, %v786_v59  ;;  %v1208_v23 = vld [vmem:[#allocation5 + $0x30] sm:$0xff]  ;;  %v1209_v26 = vld [vmem:[#allocation5 + $0x38] sm:$0xff]  ;;  %v812_v59 = vld [vmem:[%s2354_s4] sm:$0x1f] }
 0x13e   : > { %v2243_v37 = vadd.f32 %v725_v28, %v705_v54  ;;  %v702_v55 = vmul.f32 %v2218_v15, %v541_v25  ;;  %v1211_v28 = vld [vmem:[#allocation5 + $0x48] sm:$0xff]  ;;  %v1692_v54 = vpack.c.bf16 %v1213_v31, %v1212_v30 }
 0x13f   : > { %v726_v39 = vmul.f32 %v718_v35, %v543_v16  ;;  %v546_v63 = vpop.f32.mrb[10].mxu1  ;;  %1131 = vperm.xlu1 %1792, %v728_v60   ;;  %1104 = vperm.xlu0 %1791, %v728_v60   ;;  %v1215_v25 = vld [vmem:[#allocation5 + $0x68] sm:$0xff]  ;;  %v1216_v35 = vld [vmem:[#allocation5 + $0x70] sm:$0xff] }
 0x140   : > { %v706_v40 = vadd.f32 %v702_v55, %v682_v36  ;;  %v547_v41 = vadd.f32 %v546_v63, %v2227_v27  ;;  %904 = vmatmul.mubr.f32.vlgmr.msra.gmra.mrb[12].mxu1 %v728_v60  ;;  %993 = vmatmul.mubr.f32.vlgmr.msra.gmra.mrb[8].mxu0 %v728_v60  ;;  %v548_v42 = vpop.f32.mrb[11].mxu1  ;;  %v1648_v27 = vpack.c.bf16 %v761_v45, %v756_v44 }
 0x141   : > { %1643 = vmatpush3.bf16.msra.mxu1 %v2196_v53  ;;  %v549_v46 = vadd.f32 %v548_v42, %v2231_v33  ;;  %909 = vmatprep.mubr.f32.mxu1 %v1942_v0  ;;  %v766_v53 = vld [vmem:[#allocation2 + $0x110] sm:$0xff]  ;;  %v771_v33 = vld [vmem:[#allocation2 + $0x138] sm:$0xff] }
 0x142   : > { %v2250_v15 = vadd.f32 %v726_v39, %v706_v40  ;;  %v703_v47 = vmul.f32 %v698_v22, %v547_v41  ;;  %998 = vmatprep.mubr.f32.mxu0 %v1942_v0  ;;  %1645 = vmatprep.subr.bf16.mxu1 %v1644_v38  ;;  %v1652_v51 = vpack.c.bf16 %v771_v33, %v766_v53  ;;  %v1207_v22 = vld [vmem:[#allocation5 + $0x28] sm:$0xff] }
 0x143   : > { %v727_v48 = vmul.f32 %v722_v43, %v549_v46  ;;  %1793 = vset.pattern.permute.xlu1 %v1943_v1  ;;  %1794 = vset.pattern.permute.xlu0 %v1945_v12  ;;  %v1680_v24 = vpack.c.bf16 %v1207_v22, %v1206_v20 }
 0x144   : > { %v707_v49 = vadd.f32 %v703_v47, %v683_v32  ;;  %910 = vmatmul.mubr.f32.gmra.mrb[14].mxu1 %v2243_v37  ;;  %999 = vmatmul.mubr.f32.gmra.mrb[10].mxu0 %v2243_v37  ;;  %v1214_v32 = vld [vmem:[#allocation5 + $0x60] sm:$0xff] }
 0x145   : > { %1647 = vmatpush3.bf16.msra.mxu1 %v1644_v38  ;;  %1155 = vperm.xlu1 %1793, %v728_v60   ;;  %v1696_v34 = vpack.c.bf16 %v1215_v25, %v1214_v32 }
 0x146   : > { %v731_v50 = vadd.f32 %v727_v48, %v707_v49  ;;  %1179 = vperm.xlu0 %1794, %v728_v60   ;;  %915 = vmatprep.mubr.f32.mxu1 %v1942_v0 }
 0x147   : > { %1004 = vmatprep.mubr.f32.mxu0 %v1942_v0  ;;  %1649 = vmatprep.subr.bf16.mxu1 %v1648_v27 }
 0x148   : > { %916 = vmatmul.mubr.f32.gmra.mrb[16].mxu1 %v2250_v15  ;;  %1005 = vmatmul.mubr.f32.gmra.mrb[12].mxu0 %v2250_v15 }
 0x149   : > { %1651 = vmatpush3.bf16.msra.mxu1 %v1648_v27  ;;  %1795 = vset.pattern.permute.xlu1 %v1944_v2 }
 0x14a   : > { %1796 = vset.pattern.permute.xlu0 %v1946_v17  ;;  %1109 = vperm.xlu1 %1795, %v2243_v37  }
 0x14b   : > { %1135 = vperm.xlu0 %1796, %v2243_v37   ;;  %921 = vmatprep.mubr.f32.mxu1 %v1942_v0 }
 0x14c   : > { %1010 = vmatprep.mubr.f32.mxu0 %v1942_v0  ;;  %1653 = vmatprep.subr.bf16.mxu1 %v1652_v51  ;;  %v1664_v0 = vpack.c.bf16 %v801_v9, %v796_v8  ;;  %v825_v8 = vrot.slane %v812_v59, %v329_v14  ;;  %v821_v9 = vrot.slane %v812_v59, %v325_v7 }
 0x14d   : > { %922 = vmatmul.mubr.f32.gmra.mrb[18].mxu1 %v731_v50  ;;  %1011 = vmatmul.mubr.f32.gmra.mrb[14].mxu0 %v731_v50 }
 0x14e   : > { %1655 = vmatpush3.bf16.msra.mxu1 %v1652_v51  ;;  %1532 = vmatprep.mubr.f32.mxu1 %v728_v60  ;;  %v1217_v60 = vld [vmem:[#allocation5 + $0x78] sm:$0xff] }
 0x14f   : > { %1797 = vset.pattern.permute.xlu1 %v1943_v1  ;;  %1801 = vset.pattern.permute.xlu0 %v1943_v1  ;;  %v1700_v36 = vpack.c.bf16 %v1217_v60, %v1216_v35 }
 0x150   : > { %1159 = vperm.xlu1 %1797, %v2243_v37   ;;  %1163 = vperm.xlu0 %1801, %v2250_v15  }
 0x151   : > { %1657 = vmatprep.subr.bf16.mxu1 %v1656_v58 }
 0x152   : > { %1659 = vmatpush3.bf16.msra.mxu1 %v1656_v58 }
 0x153   : > { %1661 = vmatprep.subr.bf16.mxu1 %v1660_v6 }
 0x154   : > { %1798 = vset.pattern.permute.xlu1 %v1945_v12  ;;  %1802 = vset.pattern.permute.xlu0 %v1944_v2 }
 0x155   : > { %1183 = vperm.xlu1 %1798, %v2243_v37   ;;  %1119 = vperm.xlu0 %1802, %v731_v50  }
 0x156   : > { %1663 = vmatpush3.bf16.msra.mxu1 %v1660_v6  ;;  %v817_v6 = vrot.slane %v812_v59, %v321_v4 }
 0x157   : > { %1665 = vmatprep.subr.bf16.mxu1 %v1664_v0 }
 0x159   : > { %1799 = vset.pattern.permute.xlu1 %v1944_v2  ;;  %1805 = vset.pattern.permute.xlu0 %v1945_v12  ;;  %v1202_v2 = vld [vmem:[#allocation5] sm:$0xff] }
 0x15a   : > { %1667 = vmatpush3.bf16.msra.mxu1 %v1664_v0  ;;  %1114 = vperm.xlu1 %1799, %v2250_v15   ;;  %v1672_v57 = vpack.c.bf16 %v1203_v18, %v1202_v2  ;;  %v829_v0 = vrot.slane %v812_v59, %v333_v21 }
 0x15b   : > { %1191 = vperm.xlu0 %1805, %v731_v50   ;;  %1669 = vmatprep.subr.bf16.mxu1 %v1668_v13 }
 0x15c   : > { %1673 = vmatprep.subr.bf16.mxu0 %v1672_v57 }
 0x15d   : > { %1675 = vmatpush3.bf16.msra.mxu0 %v1672_v57 }
 0x15e   : > { %1671 = vmatpush3.bf16.msra.mxu1 %v1668_v13  ;;  %1800 = vset.pattern.permute.xlu1 %v1946_v17  ;;  %v1204_v17 = vld [vmem:[#allocation5 + $0x10] sm:$0xff]  ;;  %v833_v13 = vrot.slane %v812_v59, %v337_v11 }
 0x15f   : > { %1139 = vperm.xlu1 %1800, %v2250_v15   ;;  %v1676_v19 = vpack.c.bf16 %v1205_v61, %v1204_v17 }
 0x161   : > { %1533 = vmatmul.mubr.f32.vlgmr.msra.gmra.mrb[20].mxu1 %v2243_v37  ;;  %1677 = vmatprep.subr.bf16.mxu0 %v1676_v19 }
 0x162   : > { %1535 = vmatprep.mubr.f32.mxu1 %v2250_v15  ;;  %1679 = vmatpush3.bf16.msra.mxu0 %v1676_v19 }
 0x163   : > { %1143 = vperm.xlu1 %1800, %v731_v50   ;;  %1681 = vmatprep.subr.bf16.mxu0 %v1680_v24 }
 0x165   : > { %1536 = vmatmul.mubr.f32.gmra.mrb[22].mxu1 %v731_v50 }
 0x166   : > { %1683 = vmatpush3.bf16.msra.mxu0 %v1680_v24 }
 0x167   : > { %1803 = vset.pattern.permute.xlu1 %v1943_v1  ;;  %v1684_v1 = vpack.c.bf16 %v1209_v26, %v1208_v23 }
 0x168   : > { %1167 = vperm.xlu1 %1803, %v731_v50  }
 0x169   : > { %1685 = vmatprep.subr.bf16.mxu0 %v1684_v1 }
 0x16a   : > { %1687 = vmatpush3.bf16.msra.mxu0 %v1684_v1 }
 0x16c   : > { %1804 = vset.pattern.permute.xlu1 %v1945_v12  ;;  %v1210_v12 = vld [vmem:[#allocation5 + $0x40] sm:$0xff] }
 0x16d   : > { %1187 = vperm.xlu1 %1804, %v2250_v15   ;;  %v1688_v29 = vpack.c.bf16 %v1211_v28, %v1210_v12 }
 0x16f   : > { %1689 = vmatprep.subr.bf16.mxu0 %v1688_v29 }
 0x170   : > { %1691 = vmatpush3.bf16.msra.mxu0 %v1688_v29 }
 0x171   : > { %1693 = vmatprep.subr.bf16.mxu0 %v1692_v54 }
 0x174   : > { %1695 = vmatpush3.bf16.msra.mxu0 %v1692_v54 }
 0x175   : > { %1697 = vmatprep.subr.bf16.mxu0 %v1696_v34 }
 0x178   : > { %1699 = vmatpush3.bf16.msra.mxu0 %v1696_v34 }
 0x179   : > { %1701 = vmatprep.subr.bf16.mxu0 %v1700_v36 }
 0x17c   : > { %1703 = vmatpush3.bf16.msra.mxu0 %v1700_v36 }
 0x1be   : > { %v1132_v16 = vpop.permute.xlu1 %1131  ;;  %v1105_v27 = vpop.permute.xlu0 %1104 }
 0x1c4   : > { %v1156_v37 = vpop.permute.xlu1 %1155 }
 0x1c5   : > { %v1180_v52 = vpop.permute.xlu0 %1179 }
 0x1c9   : > { %v1110_v55 = vpop.permute.xlu1 %1109 }
 0x1ca   : > { %v1136_v5 = vpop.permute.xlu0 %1135 }
 0x1cf   : > { %v1160_v45 = vpop.permute.xlu1 %1159  ;;  %v1164_v2 = vpop.permute.xlu0 %1163 }
 0x1d4   : > { %v1184_v49 = vpop.permute.xlu1 %1183  ;;  %v1120_v31 = vpop.permute.xlu0 %1119 }
 0x1d9   : > { %v1115_v56 = vpop.permute.xlu1 %1114 }
 0x1de   : > { %v1140_v58 = vpop.permute.xlu1 %1139 }
 0x1e2   : > { %v1144_v17 = vpop.permute.xlu1 %1143 }
 0x1e7   : > { %v1168_v60 = vpop.permute.xlu1 %1167 }
 0x213   : > { %v905_v38 = vpop.f32.mrb[12].mxu1  ;;  %v994_v39 = vpop.f32.mrb[8].mxu0 }
 0x214   : > { %v907_v63 = vpop.f32.mrb[13].mxu1  ;;  %v996_v40 = vpop.f32.mrb[9].mxu0  ;;  %v906_v10 = vadd.f32 %v905_v38, %v817_v6  ;;  %v995_v18 = vadd.f32 %v994_v39, %v825_v8 }
 0x215   : > { %v908_v57 = vadd.f32 %v907_v63, %v821_v9  ;;  %v997_v61 = vadd.f32 %v996_v40, %v829_v0 }
 0x216   : > { %v1122_v22 = vmul.f32 %v1105_v27, %v906_v10  ;;  %v1170_v21 = vmul.f32 %v1156_v37, %v995_v18 }
 0x217   : > { %v911_v41 = vpop.f32.mrb[14].mxu1  ;;  %v1000_v42 = vpop.f32.mrb[10].mxu0  ;;  %v1146_v1 = vmul.f32 %v1132_v16, %v908_v57  ;;  %v1194_v62 = vmul.f32 %v1180_v52, %v997_v61 }
 0x218   : > { %v913_v43 = vpop.f32.mrb[15].mxu1  ;;  %v1002_v44 = vpop.f32.mrb[11].mxu0  ;;  %v912_v3 = vadd.f32 %v911_v41, %v817_v6  ;;  %v1001_v19 = vadd.f32 %v1000_v42, %v825_v8 }
 0x219   : > { %v914_v4 = vadd.f32 %v913_v43, %v821_v9  ;;  %v1003_v20 = vadd.f32 %v1002_v44, %v829_v0 }
 0x21a   : > { %v1123_v23 = vmul.f32 %v1110_v55, %v912_v3  ;;  %v1171_v54 = vmul.f32 %v1160_v45, %v1001_v19 }
 0x21b   : > { %v917_v46 = vpop.f32.mrb[16].mxu1  ;;  %v1006_v15 = vpop.f32.mrb[12].mxu0  ;;  %v1147_v11 = vmul.f32 %v1136_v5, %v914_v4  ;;  %v1195_v32 = vmul.f32 %v1184_v49, %v1003_v20 }
 0x21c   : > { %v919_v47 = vpop.f32.mrb[17].mxu1  ;;  %v1008_v48 = vpop.f32.mrb[13].mxu0  ;;  %v918_v12 = vadd.f32 %v917_v46, %v817_v6  ;;  %v1007_v16 = vadd.f32 %v1006_v15, %v825_v8 }
 0x21d   : > { %v920_v25 = vadd.f32 %v919_v47, %v821_v9  ;;  %v1009_v45 = vadd.f32 %v1008_v48, %v829_v0 }
 0x21e   : > { %v1124_v37 = vmul.f32 %v1115_v56, %v918_v12  ;;  %v1172_v59 = vmul.f32 %v1164_v2, %v1007_v16  ;;  %v1188_v56 = vpop.permute.xlu1 %1187 }
 0x21f   : > { %v1148_v27 = vmul.f32 %v1140_v58, %v920_v25 }
 0x220   : > { %v923_v53 = vpop.f32.mrb[18].mxu1  ;;  %v1012_v33 = vpop.f32.mrb[14].mxu0 }
 0x221   : > { %v925_v50 = vpop.f32.mrb[19].mxu1  ;;  %v1014_v51 = vpop.f32.mrb[15].mxu0  ;;  %v924_v7 = vadd.f32 %v923_v53, %v817_v6  ;;  %v1013_v55 = vadd.f32 %v1012_v33, %v825_v8 }
 0x222   : > { %v926_v29 = vadd.f32 %v925_v50, %v821_v9  ;;  %v1015_v43 = vadd.f32 %v1014_v51, %v829_v0  ;;  %v1192_v33 = vpop.permute.xlu0 %1191  ;;  %v1196_v9 = vmul.f32 %v1188_v56, %v1009_v45  ;;  %v1440_v0 = vld [vmem:[%s2356_s6] ss:$0 sm:$0xff] }
 0x223   : > { %v1125_v36 = vmul.f32 %v1120_v31, %v924_v7  ;;  %v1173_v53 = vmul.f32 %v1168_v60, %v1013_v55 }
 0x224   : > { %v1149_v42 = vmul.f32 %v1144_v17, %v926_v29  ;;  %v1197_v15 = vmul.f32 %v1192_v33, %v1015_v43 }
 0x234   : > { %v1534_v14 = vpop.f32.mrb[20].mxu1 }
 0x235   : > { %v1089_v24 = vadd.f32 %v1534_v14, %v833_v13  ;;  %v1083_v26 = vpop.f32.mrb[21].mxu1 }
 0x236   : > { %v1084_v28 = vadd.f32 %v1083_v26, %v833_v13 }
 0x237   : > { %v1127_v30 = vadd.f32 %v1123_v23, %v1089_v24 }
 0x238   : > { %v1126_v34 = vadd.f32 %v1122_v22, %v1084_v28  ;;  %v1537_v35 = vpop.f32.mrb[22].mxu1 }
 0x239   : > { %v1151_v38 = vadd.f32 %v1147_v11, %v1127_v30  ;;  %v1099_v39 = vadd.f32 %v1537_v35, %v833_v13  ;;  %v1093_v63 = vpop.f32.mrb[23].mxu1 }
 0x23a   : > { %v1150_v40 = vadd.f32 %v1146_v1, %v1126_v34  ;;  %v1094_v41 = vadd.f32 %v1093_v63, %v833_v13 }
 0x23b   : > { %v1175_v44 = vadd.f32 %v1171_v54, %v1151_v38  ;;  %v1129_v46 = vadd.f32 %v1125_v36, %v1099_v39 }
 0x23c   : > { %v1128_v49 = vadd.f32 %v1124_v37, %v1094_v41  ;;  %v1174_v47 = vadd.f32 %v1170_v21, %v1150_v40 }
 0x23d   : > { %v1199_v50 = vadd.f32 %v1195_v32, %v1175_v44  ;;  %v1153_v52 = vadd.f32 %v1149_v42, %v1129_v46 }
 0x23e   : > { %v1152_v5 = vadd.f32 %v1148_v27, %v1128_v49  ;;  %v1198_v6 = vadd.f32 %v1194_v62, %v1174_v47 }
 0x23f   : > { %v1177_v8 = vadd.f32 %v1173_v53, %v1153_v52 }
 0x240   : > { %1570 = vmatprep.mubr.f32.mxu0 %v1198_v6  ;;  %v1176_v51 = vadd.f32 %v1172_v59, %v1152_v5 }
 0x241   : > { %1571 = vmatmul.mubr.f32.vlgmr.msra.gmra.mrb[16].mxu0 %v1199_v50  ;;  %v1201_v58 = vadd.f32 %v1197_v15, %v1177_v8 }
 0x242   : > { %v1200_v48 = vadd.f32 %v1196_v9, %v1176_v51 }
 0x244   : > { %1573 = vmatprep.mubr.f32.mxu0 %v1200_v48 }
 0x245   : > { %1574 = vmatmul.mubr.f32.gmra.mrb[18].mxu0 %v1201_v58 }
 0x314   : > { %v1572_v10 = vpop.f32.mrb[16].mxu0 }
 0x315   : > { %v1297_v3 = vadd.f32 %v1572_v10, %v1440_v0  ;;  %v1291_v13 = vpop.f32.mrb[17].mxu0 }
 0x316   : > { %v1292_v2 = vadd.f32 %v1440_v0, %v1291_v13 }
 0x317   : > { %1311 = vst [vmem:[%s302_s21 + $0x8] sm:$0xff] %v1297_v3 }
 0x318   : > { %1310 = vst [vmem:[%s302_s21] sm:$0xff] %v1292_v2  ;;  %v1575_v18 = vpop.f32.mrb[18].mxu0 }
 0x319   : > { %v1307_v57 = vadd.f32 %v1575_v18, %v1440_v0  ;;  %v1301_v17 = vpop.f32.mrb[19].mxu0 }
 0x31a   : > { %v1302_v61 = vadd.f32 %v1440_v0, %v1301_v17 }
 0x31b   : > { %1313 = vst [vmem:[%s302_s21 + $0x18] sm:$0xff] %v1307_v57 }
 0x31c   : > { %1312 = vst [vmem:[%s302_s21 + $0x10] sm:$0xff] %v1302_v61 }
 0x31d   : > { %1877 = shalt.err (!%p1874_p11)
}
 0x31e   : > { %s1878_s19 = scalar_lea.hbm %s2307_s9, 512  ;;  %s1882_s18 = scalar_lea.hbm %s2357_s7, 1024 }
 0x31f   : > { %p1879_p13 = scmp.ne.s32.totalorder %s2307_s9, %s1878_s19  ;;  %p1883_p6 = scmp.lt.u32.totalorder %s2307_s9, %s2357_s7 }
 0x320   : > { %p1884_p9 = scmp.lt.u32.totalorder %s1882_s18, %s1878_s19  ;;  %p1886_p10 = scmp.lt.u32.totalorder %s1878_s19, %s2307_s9 }
 0x321   : > { %p1880_p0 = pnand %p1879_p13, %p2371_p1 }
 0x322   : > { %p1885_p12 = por %p1884_p9, %p1883_p6 }
 0x323   : > { %p1881_p5 = pneg %p1880_p0 }
 0x324   : > { %p1887_p2 = por %p1886_p10, %p1885_p12 }
 0x326   : > { %p1888_p3 = pnand %p1887_p2, %p1881_p5 }
 0x328   : > { %1891 = shalt.err (!%p1888_p3)
}
 0x329   : > { %s1948_s23 = smov 128   ;;  %s1949_s29 = smov 8  }
 0x32a   : > { %1714 = dma.vmem_to_hbm [thread:$0]  (%p2371_p1), %s2302_s22, 512, %s2307_s9, %s2309_s15, %s1948_s23, %s1948_s23, %s1949_s29  }
 0x32b PF: > { %p1731_p4 = scmp.ge.s32.totalorder %s1934_s27, 2  ;;  %s1343_s8 = sand.u32 1, %s1922_s24  }
 0x32c   : > { %p2372_p7 = scmp.ne.s32.totalorder %s2363_s12, 0  ;;  %s1344_s28 = scalar_lea.sflag [#allocation4], %s1343_s8 }
 0x32e   : > { %p1724_p8 = pnand %p1731_p4, %p2372_p7 }
 0x330   : > { %1917 = dma.done.wait (!%p1724_p8), %s1344_s28, 512  }
 0x331   : > { %1919 = vsyncadd (!%p1724_p8), %s1344_s28, 4294966784  ;;  %s2373_s10 = sld [smem:[#allocation11_spill]]  ;;  %p19_p11 = scmp.ge.s32.totalorder %s2015_s30, 4  }
 0x332   : > { %s2374_s24 = smov %s1926_s25  ;;  %s2375_s25 = smov %s1930_s26 }
 0x333   : > { %s2377_s27 = smov %s2015_s30  ;;  %21 = sbr.rel (!%p19_p11) target bundleno = 5 (0x5), region = 92 }
 0x337   : > { %s2376_s26 = smov %s2373_s10 }
 0x33a   :  { %1349 = vsyncpa [#allocation3], 1 }
 0x33b   :  { %1351 = vsyncpa [#allocation3 + $0x1], 1 }
 0x33c   :  { %1352 = vsyncpa [#allocation6], 1 }
 0x33d   :  { %1353 = vsyncpa [#allocation4], 1 }
 0x33e   :  { %1355 = vsyncpa [#allocation4 + $0x1], 1 }

// kernel: tpu_custom_call.1
= control target key start
LH: loop header
LB: loop body
LE: loop exit
PB: predicated region body
PF: predicated region fallthrough
CT: control target
= control target key end

     0   :  { %12 = vsyncpa [#allocation3], 0  ;;  %s2350_s0 = inlined_call_operand.vmem [shape: f32[64,4], index: 0, kind: input, shape index: {}]   ;;  %s2351_s1 = inlined_call_operand.vmem [shape: f32[4,640], index: 1, kind: input, shape index: {}]   ;;  %s2352_s2 = inlined_call_operand.vmem [shape: f32[1,640], index: 2, kind: input, shape index: {}]   ;;  %s2353_s3 = inlined_call_operand.hbm [shape: f32[128,640], index: 3, kind: input, shape index: {}]   ;;  %s2354_s4 = inlined_call_operand.vmem [shape: f32[1,640], index: 4, kind: input, shape index: {}]   ;;  %s2355_s5 = inlined_call_operand.hbm [shape: f32[128,128], index: 5, kind: input, shape index: {}]   ;;  %s2356_s6 = inlined_call_operand.vmem [shape: f32[1,128], index: 6, kind: input, shape index: {}]   ;;  %s2357_s7 = inlined_call_operand.hbm [shape: f32[64,128], index: 7, kind: output, shape index: {}]  }
   0x1   :  { %13 = vsyncpa [#allocation6], 0 }
   0x2   :  { %14 = vsyncpa [#allocation4], 0 }
   0x3   :  { %16 = vsyncpa [#allocation4 + $0x1], 0  ;;  %s1990_s24 = smov 0   ;;  %s1992_s25 = smov 0  }
   0x4   :  { %s1994_s26 = smov 0   ;;  %s1996_s27 = smov 0  }
   0x5 LB: > { %s2011_s28 = sadd.s32 4294967295, %s1934_s27   ;;  %s1412_s29 = sadd.s32 4294967294, %s1934_s27   ;;  %s1934_s27 = sphi %s1996_s27, %s2377_s27   ;;  %s1930_s26 = sphi %s1994_s26, %s2376_s26   ;;  %s1926_s25 = sphi %s1992_s25, %s2375_s25   ;;  %s1922_s24 = sphi %s1990_s24, %s2374_s24  }
   0x6   : > { %s2015_s30 = sadd.s32 1, %s1934_s27   ;;  %s181_s8 = sadd.s32 1, %s1930_s26 }
   0x7   : > { %s178_s9 = ssub.s32 %s1934_s27, %s2015_s30  ;;  %p191_p0 = scmp.ne.s32.totalorder %s1930_s26, %s1926_s25 }
   0x8   : > { %p179_p1 = scmp.eq.s32.totalorder %s178_s9, 0  ;;  %p192_p2 = scmp.eq.s32.totalorder %s2011_s28, 1 }
   0x9   : > { %p197_p3 = scmp.ne.s32.totalorder %s1926_s25, %s1922_s24  ;;  %p198_p4 = scmp.eq.s32.totalorder %s1412_s29, 1 }
   0xa   : > { %s2026_s10 = scalar_select %p179_p1, %s1930_s26, %s181_s8  }
   0xb   : > { %p2028_p5 = por %p192_p2, %p191_p0  ;;  %p2032_p6 = por %p198_p4, %p197_p3 }
   0xc   : > { %2361 = sst [smem:[#allocation11_spill]] %s2026_s10  ;;  %p1413_p7 = scmp.ge.s32.totalorder %s1934_s27, 1 }
   0xd   : > { %s2362_s11 = scalar_select %p2028_p5, 1, 0 }
   0xe   : > { %s2363_s12 = scalar_select %p2032_p6, 1, 0 }
   0xf   : > { %p205_p8 = scmp.lt.s32.totalorder %s1934_s27, 3  ;;  %p2358_p9 = scmp.eq.s32.totalorder %s2011_s28, 0 }
  0x10   : > { %s1936_s14 = smov [#allocation2]   ;;  %s1937_s17 = smov [#allocation5]  }
  0x11   : > { %p2039_p10 = pnand %p1413_p7, %p205_p8  ;;  %s223_s15 = sshll.u32 %s1936_s14, 4  ;;  %s224_s15 = int_to_ptr.vmem [resolvable:$true] %s223_s15 }
  0x12   : > { %s239_s18 = sshll.u32 %s1937_s17, 4  ;;  %s1808_s21 = scalar_lea.hbm %s2353_s3, 10240  ;;  %s2051_s18 = int_to_ptr.vmem [resolvable:$true] %s239_s18 }
  0x13   : > { %s2364_s13 = scalar_select %p2039_p10, 1, 0 }
  0x14   : > { %p1716_p11 = pneg %p2039_p10  ;;  %p1809_p13 = scmp.ne.s32.totalorder %s2353_s3, %s1808_s21 }
  0x15   : > { %p1815_p3 = scmp.lt.u32.totalorder %s1808_s21, %s2353_s3 }
  0x16   : > { %p2047_p12 = pnand %p2358_p9, %p1716_p11 }
  0x18   : > { %p1810_p0 = pneg %p2047_p12 }
  0x1a   : > { %p1811_p1 = pnand %p1810_p0, %p1809_p13 }
  0x1c   : > { %p1812_p2 = pneg %p1811_p1 }
  0x1e   : > { %p1817_p4 = pnand %p1815_p3, %p1812_p2 }
  0x20   : > { %1820 = shalt.err (!%p1817_p4)
}
  0x21   : > { %s1821_s9 = scalar_lea.vmem %s224_s15, 10240  ;;  %p1829_p9 = scmp.lt.s32.totalorder %s224_s15, %s224_s15 }
  0x22   : > { %p1822_p7 = scmp.ne.s32.totalorder %s224_s15, %s1821_s9  ;;  %p1830_p6 = scmp.lt.s32.totalorder %s1821_s9, %s1821_s9 }
  0x24   : > { %p1824_p8 = pnand %p1822_p7, %p1810_p0  ;;  %p1831_p5 = por %p1830_p6, %p1829_p9 }
  0x26   : > { %p1825_p11 = pneg %p1824_p8 }
  0x28   : > { %p1832_p10 = pnand %p1831_p5, %p1825_p11 }
  0x2a   : > { %1835 = shalt.err (!%p1832_p10)
}
  0x2b   : > { %s1938_s14 = smov 640   ;;  %s1939_s17 = smov 40  }
  0x2c   : > { %1719 = dma.hbm_to_vmem [thread:$0]  (!%p2047_p12), %s2353_s3, 10240, %s224_s15, [#allocation3], %s1938_s14, %s1938_s14, %s1939_s17  }
  0x2d   : > { %s1836_s23 = scalar_lea.hbm %s2355_s5, 2048 }
  0x2e   : > { %p1837_p13 = scmp.ne.s32.totalorder %s2355_s5, %s1836_s23  ;;  %p1843_p9 = scmp.lt.u32.totalorder %s1836_s23, %s2355_s5 }
  0x30   : > { %p1839_p5 = pnand %p1837_p13, %p1810_p0 }
  0x32   : > { %p1840_p6 = pneg %p1839_p5 }
  0x34   : > { %p1845_p10 = pnand %p1843_p9, %p1840_p6 }
  0x36   : > { %1848 = shalt.err (!%p1845_p10)
}
  0x37   : > { %s1849_s15 = scalar_lea.vmem %s2051_s18, 2048  ;;  %p1857_p4 = scmp.lt.s32.totalorder %s2051_s18, %s2051_s18 }
  0x38   : > { %p1850_p1 = scmp.ne.s32.totalorder %s2051_s18, %s1849_s15  ;;  %p1858_p7 = scmp.lt.s32.totalorder %s1849_s15, %s1849_s15 }
  0x3a   : > { %p1852_p2 = pnand %p1850_p1, %p1810_p0  ;;  %p1859_p8 = por %p1858_p7, %p1857_p4 }
  0x3c   : > { %p1853_p3 = pneg %p1852_p2 }
  0x3e   : > { %p1860_p11 = pnand %p1859_p8, %p1853_p3 }
  0x40   : > { %1863 = shalt.err (!%p1860_p11)
}
  0x41   : > { %s1940_s10 = smov 128   ;;  %s1941_s14 = smov 8  }
  0x42   : > { %1722 = dma.hbm_to_vmem [thread:$0]  (!%p2047_p12), %s2355_s5, 2048, %s2051_s18, [#allocation6], %s1940_s10, %s1940_s10, %s1941_s14  }
  0x43   : > { %p2366_p13 = scmp.ne.s32.totalorder %s2364_s13, 0 }
  0x44   : > { %p2367_p0 = scmp.eq.s32.totalorder (!%p2366_p13), %s2011_s28, 0 }
  0x45   : > { %267 = sbr.rel (%p2366_p13) target bundleno = 811 (0x32b), region = 48 }
  0x4c   : > { %1909 = dma.done.wait (%p2367_p0), [#allocation3], 10240   ;;  %p2368_p5 = pmov %p2367_p0 }
  0x4d   : > { %p2369_p6 = pmov %p2367_p0 }
  0x4e   : > { %1911 = vsyncadd (%p2368_p5), [#allocation3], 4294957056 }
  0x4f   : > { %1913 = dma.done.wait (%p2369_p6), [#allocation6], 2048   ;;  %p2370_p9 = pmov %p2367_p0 }
  0x50   : > { %s1421_s16 = sshll.u32 %s2011_s28, 2  ;;  %v1942_v0 = vmov 0.0   ;;  %v1943_v1 = vmov 2   ;;  %v1944_v2 = vmov 0   ;;  %v314_v3 = vld [vmem:[%s2351_s1] sm:$0xff]  ;;  %vm362_vm0 = vcmask 1043456  }
  0x51   : > { %1915 = vsyncadd (%p2370_p9), [#allocation6], 4294965248  ;;  %437 = vmatprep.mubr.f32.mxu0 %v1942_v0  ;;  %449 = vmatprep.mubr.f32.mxu1 %v1942_v0  ;;  %p304_p12 = scmp.lt.s32.totalorder %s1421_s16, 7  ;;  %v347_v5 = vcombine.high %v314_v3, %v314_v3  ;;  %v315_v6 = vld [vmem:[%s2351_s1 + $0x8] sm:$0xff]  ;;  %vm349_vm1 = vcmask 31744   ;;  %v1945_v12 = vmov 3  }
  0x52   : > { %1779 = vset.pattern.permute.xlu1 %v1943_v1  ;;  %1777 = vset.pattern.permute.xlu0 %v1944_v2  ;;  %v316_v8 = vld [vmem:[%s2351_s1 + $0x10] sm:$0xf]  ;;  %v348_v9 = vcombine.high %v315_v6, %v315_v6  ;;  %v733_v13 = vld [vmem:[#allocation2 + $0x8] sm:$0xff]  ;;  %v732_v15 = vld [vmem:[#allocation2] sm:$0xff]  ;;  %v1946_v17 = vmov 1   ;;  %s1446_s23 = sshll.u32 %s2011_s28, 9 }
  0x53   : > { %s2379_s16 = smov (!%p304_p12, %s1421_s16), 7  ;;  %1423 = vmatprep.subr.msk.mxu0 %vm362_vm0, %v347_v5  ;;  %1704 = vmatprep.subr.msk.mxu1 %vm362_vm0, %v347_v5  ;;  %v738_v14 = vld [vmem:[#allocation2 + $0x30] sm:$0xff]  ;;  %v737_v16 = vld [vmem:[#allocation2 + $0x28] sm:$0xff]  ;;  %v735_v19 = vld [vmem:[#allocation2 + $0x18] sm:$0xff]  ;;  %s2307_s9 = scalar_lea.hbm %s2357_s7, %s1446_s23 }
  0x54   : > { %s1422_s13 = sshll.u32 %s2379_s16, 3  ;;  %1424 = vmatpush1.msk.msra.mxu0 %vm362_vm0, %v314_v3  ;;  %1705 = vmatpush1.msk.msra.mxu1 %vm362_vm0, %v314_v3  ;;  %v1576_v18 = vpack.c.bf16 %v738_v14, %v733_v13  ;;  %v740_v20 = vld [vmem:[#allocation2 + $0x40] sm:$0xff]  ;;  %v734_v21 = vld [vmem:[#allocation2 + $0x10] sm:$0xff]  ;;  %v739_v22 = vld [vmem:[#allocation2 + $0x38] sm:$0xff]  ;;  %v1578_v23 = vpack.c.bf16 %v737_v16, %v732_v15  ;;  %s300_s16 = sand.u32 1, %s1926_s25  }
  0x55   : > { %s307_s21 = scalar_lea.vmem %s2350_s0, %s1422_s13  ;;  %1492 = vmatprep.subr.msk.mxu0 %vm362_vm0, %v316_v8  ;;  %1429 = vmatprep.subr.msk.mxu1 %vm362_vm0, %v348_v9  ;;  %v1608_v24 = vpack.c.bf16 %v740_v20, %v735_v19  ;;  %v743_v25 = vld [vmem:[#allocation2 + $0x58] sm:$0xff]  ;;  %v748_v26 = vld [vmem:[#allocation2 + $0x80] sm:$0xff]  ;;  %v742_v27 = vld [vmem:[#allocation2 + $0x50] sm:$0xff]  ;;  %v1610_v28 = vpack.c.bf16 %v739_v22, %v734_v21  ;;  %s1420_s13 = sshll.u32 %s300_s16, 5 }
  0x56   : > { %v310_v4 = vld [vmem:[%s307_s21] sm:$0xff]  ;;  %v2124_v7 = vld [vmem:[%s307_s21 + $0x10] sm:$0xff]  ;;  %v2138_v10 = vld [vmem:[%s307_s21 + $0x8] sm:$0xff]  ;;  %v1580_v32 = vpack.c.bf16 %v748_v26, %v743_v25  ;;  %s2309_s15 = scalar_lea.sflag [#allocation4], %s300_s16  ;;  %p2371_p1 = scmp.ne.s32.totalorder %s2362_s11, 0 }
  0x57   : > { %685 = vperm.xlu1 %1779, %v310_v4   ;;  %637 = vperm.xlu0 %1777, %v310_v4   ;;  %v2140_v11 = vld [vmem:[%s307_s21 + $0x18] sm:$0xff]  ;;  %v745_v30 = vld [vmem:[#allocation2 + $0x68] sm:$0xff]  ;;  %v750_v31 = vld [vmem:[#allocation2 + $0x90] sm:$0xff]  ;;  %s302_s21 = scalar_lea.vmem [#allocation7], %s1420_s13  ;;  %s1947_s10 = smov [#allocation7]  }
  0x58   : > { %1425 = vmatmul.mubr.msk.f32.vlgmr.msra.gmra.mrb[0].mxu0 %vm349_vm1, %v310_v4  ;;  %1427 = vmatmul.mubr.msk.f32.vlgmr.msra.gmra.mrb[0].mxu1 %vm349_vm1, %v2124_v7  ;;  %v747_v29 = vld [vmem:[#allocation2 + $0x78] sm:$0xff]  ;;  %v744_v34 = vld [vmem:[#allocation2 + $0x60] sm:$0xff]  ;;  %v749_v35 = vld [vmem:[#allocation2 + $0x88] sm:$0xff]  ;;  %v1612_v36 = vpack.c.bf16 %v750_v31, %v745_v30  ;;  %s1328_s22 = sshll.u32 %s302_s21, 4  ;;  %s1868_s14 = sshll.u32 %s1947_s10, 4  ;;  %s2302_s22 = int_to_ptr.vmem [resolvable:$true] %s1328_s22  ;;  %s1869_s14 = int_to_ptr.vmem [resolvable:$false] %s1868_s14 }
  0x59   : > { %443 = vmatprep.mubr.f32.mxu0 %v1942_v0  ;;  %1493 = vmatpush3.msk.msra.mxu0 %vm362_vm0, %v316_v8  ;;  %v1582_v33 = vpack.c.bf16 %v747_v29, %v742_v27  ;;  %v753_v37 = vld [vmem:[#allocation2 + $0xa8] sm:$0xff]  ;;  %v758_v38 = vld [vmem:[#allocation2 + $0xd0] sm:$0xff]  ;;  %v752_v39 = vld [vmem:[#allocation2 + $0xa0] sm:$0xff]  ;;  %v1614_v43 = vpack.c.bf16 %v749_v35, %v744_v34  ;;  %s1864_s28 = scalar_lea.vmem %s2302_s22, 512  ;;  %s1870_s17 = scalar_lea.vmem %s1869_s14, 1024 }
  0x5a   : > { %455 = vmatprep.mubr.f32.mxu1 %v1942_v0  ;;  %1430 = vmatpush1.msk.msra.mxu1 %vm362_vm0, %v315_v6  ;;  %v757_v40 = vld [vmem:[#allocation2 + $0xc8] sm:$0xff]  ;;  %v755_v41 = vld [vmem:[#allocation2 + $0xb8] sm:$0xff]  ;;  %v760_v42 = vld [vmem:[#allocation2 + $0xe0] sm:$0xff]  ;;  %v1584_v44 = vpack.c.bf16 %v758_v38, %v753_v37  ;;  %p1865_p10 = scmp.ne.s32.totalorder %s2302_s22, %s1864_s28  ;;  %p1871_p4 = scmp.lt.s32.totalorder %s2302_s22, %s1869_s14 }
  0x5b   : > { %1780 = vset.pattern.permute.xlu1 %v1945_v12  ;;  %1778 = vset.pattern.permute.xlu0 %v1946_v17  ;;  %v1586_v45 = vpack.c.bf16 %v757_v40, %v752_v39  ;;  %v1616_v46 = vpack.c.bf16 %v760_v42, %v755_v41  ;;  %v754_v47 = vld [vmem:[#allocation2 + $0xb0] sm:$0xff]  ;;  %v759_v48 = vld [vmem:[#allocation2 + $0xd8] sm:$0xff]  ;;  %v768_v50 = vld [vmem:[#allocation2 + $0x120] sm:$0xff]  ;;  %p1872_p7 = scmp.lt.s32.totalorder %s1870_s17, %s1864_s28 }
  0x5c   : > { %1426 = vmatmul.mubr.msk.f32.gmra.mrb[2].mxu0 %vm349_vm1, %v2138_v10  ;;  %1428 = vmatmul.mubr.msk.f32.gmra.mrb[2].mxu1 %vm349_vm1, %v2140_v11  ;;  %v763_v49 = vld [vmem:[#allocation2 + $0xf8] sm:$0xff]  ;;  %v1618_v52 = vpack.c.bf16 %v759_v48, %v754_v47  ;;  %v762_v53 = vld [vmem:[#allocation2 + $0xf0] sm:$0xff]  ;;  %v765_v55 = vld [vmem:[#allocation2 + $0x108] sm:$0xff]  ;;  %p1866_p2 = pnand %p1865_p10, %p2371_p1 }
  0x5d   : > { %526 = vmatprep.mubr.f32.mxu1 %v1942_v0  ;;  %1494 = vmatprep.mubr.msk.f32.mxu0 %vm349_vm1, %v310_v4  ;;  %v1588_v51 = vpack.c.bf16 %v768_v50, %v763_v49  ;;  %v767_v54 = vld [vmem:[#allocation2 + $0x118] sm:$0xff]  ;;  %v770_v57 = vld [vmem:[#allocation2 + $0x130] sm:$0xff]  ;;  %v764_v58 = vld [vmem:[#allocation2 + $0x100] sm:$0xff]  ;;  %p1873_p8 = por %p1872_p7, %p1871_p4 }
  0x5e   : > { %709 = vperm.xlu1 %1780, %v310_v4   ;;  %661 = vperm.xlu0 %1778, %v310_v4   ;;  %v1590_v56 = vpack.c.bf16 %v767_v54, %v762_v53  ;;  %v769_v59 = vld [vmem:[#allocation2 + $0x128] sm:$0xff]  ;;  %v1620_v60 = vpack.c.bf16 %v770_v57, %v765_v55  ;;  %v778_v63 = vld [vmem:[#allocation2 + $0x170] sm:$0xff]  ;;  %v775_v6 = vld [vmem:[#allocation2 + $0x158] sm:$0xff]  ;;  %p1867_p3 = pneg %p1866_p2 }
  0x5f   : > { %1577 = vmatprep.subr.bf16.mxu1 %v1576_v18  ;;  %1609 = vmatprep.subr.bf16.mxu0 %v1608_v24  ;;  %v1622_v61 = vpack.c.bf16 %v769_v59, %v764_v58  ;;  %v773_v62 = vld [vmem:[#allocation2 + $0x148] sm:$0xff]  ;;  %v780_v8 = vld [vmem:[#allocation2 + $0x180] sm:$0xff]  ;;  %v774_v9 = vld [vmem:[#allocation2 + $0x150] sm:$0xff]  ;;  %v319_v59 = vlaneseq }
  0x60   : > { %1431 = vmatmul.mubr.msk.f32.vlgmr.msra.gmra.mrb[4].mxu1 %vm349_vm1, %v310_v4  ;;  %1495 = vmatmul.mubr.msk.f32.vlgmr.msra.gmra.mrb[4].mxu0 %vm349_vm1, %v2138_v10  ;;  %v1592_v3 = vpack.c.bf16 %v778_v63, %v773_v62  ;;  %v772_v4 = vld [vmem:[#allocation2 + $0x140] sm:$0xff]  ;;  %v777_v5 = vld [vmem:[#allocation2 + $0x168] sm:$0xff]  ;;  %v783_v14 = vld [vmem:[#allocation2 + $0x198] sm:$0xff]  ;;  %p1874_p11 = pnand %p1873_p8, %p1867_p3 }
  0x61   : > { %532 = vmatprep.mubr.f32.mxu1 %v1942_v0  ;;  %1497 = vmatprep.mubr.msk.f32.mxu0 %vm349_vm1, %v2124_v7  ;;  %v788_v15 = vld [vmem:[#allocation2 + $0x1c0] sm:$0xff]  ;;  %v782_v18 = vld [vmem:[#allocation2 + $0x190] sm:$0xff]  ;;  %v787_v19 = vld [vmem:[#allocation2 + $0x1b8] sm:$0xff]  ;;  %v2205_v62 = vshrl.u32 %v319_v59, 7 }
  0x62   : > { %1781 = vset.pattern.permute.xlu1 %v1944_v2  ;;  %1579 = vmatpush1.bf16.msra.mxu1 %v1578_v23  ;;  %v1596_v16 = vpack.c.bf16 %v788_v15, %v783_v14  ;;  %v785_v20 = vld [vmem:[#allocation2 + $0x1a8] sm:$0xff]  ;;  %v1598_v21 = vpack.c.bf16 %v787_v19, %v782_v18  ;;  %v790_v22 = vld [vmem:[#allocation2 + $0x1d0] sm:$0xff]  ;;  %v784_v23 = vld [vmem:[#allocation2 + $0x1a0] sm:$0xff] }
  0x63   : > { %641 = vperm.xlu1 %1781, %v2138_v10   ;;  %665 = vperm.xlu0 %1778, %v2138_v10   ;;  %v789_v24 = vld [vmem:[#allocation2 + $0x1c8] sm:$0xff]  ;;  %v1628_v25 = vpack.c.bf16 %v790_v22, %v785_v20  ;;  %v792_v30 = vld [vmem:[#allocation2 + $0x1e0] sm:$0xff]  ;;  %v794_v35 = vld [vmem:[#allocation2 + $0x1f0] sm:$0xff]  ;;  %v329_v14 = vsub.s32 2, %v2205_v62 }
  0x64   : > { %1432 = vmatmul.mubr.msk.f32.gmra.mrb[6].mxu1 %vm349_vm1, %v2138_v10  ;;  %1498 = vmatmul.mubr.msk.f32.gmra.mrb[6].mxu0 %vm349_vm1, %v2140_v11  ;;  %v1630_v26 = vpack.c.bf16 %v789_v24, %v784_v23  ;;  %v793_v27 = vld [vmem:[#allocation2 + $0x1e8] sm:$0xff]  ;;  %v800_v34 = vld [vmem:[#allocation2 + $0x220] sm:$0xff]  ;;  %v803_v39 = vld [vmem:[#allocation2 + $0x238] sm:$0xff] }
  0x65   : > { %538 = vmatprep.mubr.f32.mxu1 %v1942_v0  ;;  %1611 = vmatpush1.bf16.msra.mxu0 %v1610_v28  ;;  %v798_v28 = vld [vmem:[#allocation2 + $0x210] sm:$0xff]  ;;  %v797_v31 = vld [vmem:[#allocation2 + $0x208] sm:$0xff]  ;;  %v808_v40 = vld [vmem:[#allocation2 + $0x260] sm:$0xff] }
  0x66   : > { %1581 = vmatprep.subr.bf16.mxu1 %v1580_v32  ;;  %1613 = vmatprep.subr.bf16.mxu0 %v1612_v36  ;;  %v1600_v29 = vpack.c.bf16 %v798_v28, %v793_v27  ;;  %v795_v32 = vld [vmem:[#allocation2 + $0x1f8] sm:$0xff]  ;;  %v1604_v41 = vpack.c.bf16 %v808_v40, %v803_v39  ;;  %v802_v42 = vld [vmem:[#allocation2 + $0x230] sm:$0xff]  ;;  %v804_v47 = vld [vmem:[#allocation2 + $0x240] sm:$0xff] }
  0x67   : > { %645 = vperm.xlu1 %1781, %v2124_v7   ;;  %1583 = vmatpush1.bf16.msra.mxu1 %v1582_v33  ;;  %v1602_v33 = vpack.c.bf16 %v797_v31, %v792_v30  ;;  %v799_v36 = vld [vmem:[#allocation2 + $0x218] sm:$0xff]  ;;  %v1632_v37 = vpack.c.bf16 %v800_v34, %v795_v32  ;;  %v809_v48 = vld [vmem:[#allocation2 + $0x268] sm:$0xff] }
  0x68   : > { %1433 = vmatmul.mubr.msk.f32.gmra.mrb[8].mxu1 %vm349_vm1, %v2124_v7  ;;  %1782 = vset.pattern.permute.xlu0 %v1943_v1  ;;  %v1634_v38 = vpack.c.bf16 %v799_v36, %v794_v35  ;;  %v1638_v50 = vpack.c.bf16 %v809_v48, %v804_v47 }
  0x69   : > { %544 = vmatprep.mubr.f32.mxu1 %v1942_v0  ;;  %689 = vperm.xlu0 %1782, %v2138_v10  }
  0x6a   : > { %1615 = vmatpush1.bf16.msra.mxu0 %v1614_v43  ;;  %1585 = vmatprep.subr.bf16.mxu1 %v1584_v44  ;;  %v807_v43 = vld [vmem:[#allocation2 + $0x258] sm:$0xff]  ;;  %v805_v44 = vld [vmem:[#allocation2 + $0x248] sm:$0xff] }
  0x6b   : > { %1783 = vset.pattern.permute.xlu1 %v1946_v17  ;;  %1587 = vmatpush1.bf16.msra.mxu1 %v1586_v45  ;;  %v1606_v45 = vpack.c.bf16 %v807_v43, %v802_v42 }
  0x6c   : > { %1434 = vmatmul.mubr.msk.f32.gmra.mrb[10].mxu1 %vm349_vm1, %v2140_v11  ;;  %669 = vperm.xlu1 %1783, %v2124_v7  }
  0x6d   : > { %1617 = vmatprep.subr.bf16.mxu0 %v1616_v46  ;;  %1785 = vset.pattern.permute.xlu0 %v1944_v2  ;;  %v810_v46 = vld [vmem:[#allocation2 + $0x270] sm:$0xff] }
  0x6e   : > { %1589 = vmatprep.subr.bf16.mxu1 %v1588_v51  ;;  %649 = vperm.xlu0 %1785, %v2140_v11   ;;  %v1636_v49 = vpack.c.bf16 %v810_v46, %v805_v44  ;;  %v736_v51 = vld [vmem:[#allocation2 + $0x20] sm:$0xff] }
  0x6f   : > { %1619 = vmatpush1.bf16.msra.mxu0 %v1618_v52  ;;  %903 = vmatprep.mubr.f32.mxu1 %v1942_v0  ;;  %v741_v52 = vld [vmem:[#allocation2 + $0x48] sm:$0xff] }
  0x70   : > { %1784 = vset.pattern.permute.xlu1 %v1945_v12  ;;  %992 = vmatprep.mubr.f32.mxu0 %v1942_v0  ;;  %v2196_v53 = vpack.c.bf16 %v741_v52, %v736_v51 }
  0x71   : > { %713 = vperm.xlu1 %1784, %v2138_v10   ;;  %1591 = vmatpush1.bf16.msra.mxu1 %v1590_v56  ;;  %v779_v10 = vld [vmem:[#allocation2 + $0x178] sm:$0xff] }
  0x72   : > { %1788 = vset.pattern.permute.xlu0 %v1945_v12  ;;  %1621 = vmatprep.subr.bf16.mxu0 %v1620_v60  ;;  %v1626_v13 = vpack.c.bf16 %v779_v10, %v774_v9 }
  0x73   : > { %717 = vperm.xlu0 %1788, %v2124_v7   ;;  %1623 = vmatpush1.bf16.msra.mxu0 %v1622_v61 }
  0x74   : > { %1593 = vmatprep.subr.bf16.mxu1 %v1592_v3 }
  0x75   : > { %1786 = vset.pattern.permute.xlu1 %v1943_v1 }
  0x76   : > { %693 = vperm.xlu1 %1786, %v2124_v7   ;;  %v1594_v7 = vpack.c.bf16 %v777_v5, %v772_v4  ;;  %v321_v4 = vsub.s32 0, %v2205_v62  ;;  %v317_v5 = vld [vmem:[%s2352_s2] sm:$0x1f] }
  0x77   : > { %1791 = vset.pattern.permute.xlu0 %v1944_v2  ;;  %v2227_v27 = vrot.slane %v317_v5, %v329_v14 }
  0x78   : > { %1595 = vmatpush1.bf16.msra.mxu1 %v1594_v7  ;;  %v325_v7 = vsub.s32 1, %v2205_v62 }
  0x79   : > { %1597 = vmatprep.subr.bf16.mxu1 %v1596_v16 }
  0x7a   : > { %1787 = vset.pattern.permute.xlu1 %v1946_v17  ;;  %v326_v18 = vrot.slane %v317_v5, %v325_v7 }
  0x7b   : > { %673 = vperm.xlu1 %1787, %v2140_v11  }
  0x7c   : > { %1599 = vmatpush1.bf16.msra.mxu1 %v1598_v21  ;;  %v333_v21 = vsub.s32 3, %v2205_v62 }
  0x7d   : > { %1601 = vmatprep.subr.bf16.mxu1 %v1600_v29 }
  0x7f   : > { %1789 = vset.pattern.permute.xlu1 %v1943_v1 }
  0x80   : > { %697 = vperm.xlu1 %1789, %v2140_v11   ;;  %1603 = vmatpush1.bf16.msra.mxu1 %v1602_v33  ;;  %v2231_v33 = vrot.slane %v317_v5, %v333_v21 }
  0x81   : > { %1605 = vmatprep.subr.bf16.mxu1 %v1604_v41 }
  0x84   : > { %1790 = vset.pattern.permute.xlu1 %v1945_v12  ;;  %1607 = vmatpush1.bf16.msra.mxu1 %v1606_v45 }
  0x85   : > { %721 = vperm.xlu1 %1790, %v2140_v11   ;;  %v1624_v11 = vpack.c.bf16 %v780_v8, %v775_v6  ;;  %1641 = vmatprep.subr.bf16.mxu1 %v2196_v53 }
  0x87   : > { %1625 = vmatprep.subr.bf16.mxu0 %v1624_v11  ;;  %v337_v11 = vsub.s32 4, %v2205_v62 }
  0x88   : > { %1627 = vmatpush1.bf16.msra.mxu0 %v1626_v13  ;;  %v322_v13 = vrot.slane %v317_v5, %v321_v4 }
  0x89   : > { %1792 = vset.pattern.permute.xlu1 %v1946_v17  ;;  %1629 = vmatprep.subr.bf16.mxu0 %v1628_v25  ;;  %v338_v25 = vrot.slane %v317_v5, %v337_v11 }
  0x8c   : > { %1631 = vmatpush1.bf16.msra.mxu0 %v1630_v26 }
  0x8d   : > { %1633 = vmatprep.subr.bf16.mxu0 %v1632_v37 }
  0x90   : > { %1635 = vmatpush1.bf16.msra.mxu0 %v1634_v38 }
  0x91   : > { %1637 = vmatprep.subr.bf16.mxu0 %v1636_v49 }
  0x94   : > { %1639 = vmatpush1.bf16.msra.mxu0 %v1638_v50 }
  0xd6   : > { %v2199_v54 = vpop.permute.xlu1 %685  ;;  %v638_v58 = vpop.permute.xlu0 %637 }
  0xdd   : > { %v2201_v55 = vpop.permute.xlu1 %709  ;;  %v662_v61 = vpop.permute.xlu0 %661 }
  0xe2   : > { %v642_v56 = vpop.permute.xlu1 %641  ;;  %v666_v3 = vpop.permute.xlu0 %665 }
  0xe6   : > { %v646_v57 = vpop.permute.xlu1 %645 }
  0xe8   : > { %v690_v16 = vpop.permute.xlu0 %689 }
  0xeb   : > { %v2203_v60 = vpop.permute.xlu1 %669 }
  0xed   : > { %v650_v42 = vpop.permute.xlu0 %649 }
  0xf0   : > { %v2207_v63 = vpop.permute.xlu1 %713 }
  0xf5   : > { %v2218_v15 = vpop.permute.xlu1 %693 }
  0xfa   : > { %v674_v47 = vpop.permute.xlu1 %673 }
 0x12b   : > { %v439_v6 = vpop.f32.mrb[0].mxu0  ;;  %v451_v8 = vpop.f32.mrb[0].mxu1 }
 0x12c   : > { %v441_v9 = vpop.f32.mrb[1].mxu0  ;;  %v453_v10 = vpop.f32.mrb[1].mxu1  ;;  %v440_v26 = vadd.f32 %v439_v6, %v322_v13  ;;  %v452_v30 = vadd.f32 %v451_v8, %v322_v13 }
 0x12d   : > { %v442_v29 = vadd.f32 %v441_v9, %v326_v18  ;;  %v454_v43 = vadd.f32 %v453_v10, %v326_v18 }
 0x12e   : > { %v652_v39 = vmul.f32 %v638_v58, %v440_v26  ;;  %v654_v49 = vmul.f32 %v646_v57, %v452_v30  ;;  %v746_v30 = vld [vmem:[#allocation2 + $0x70] sm:$0xff] }
 0x12f   : > { %v445_v19 = vpop.f32.mrb[2].mxu0  ;;  %v457_v20 = vpop.f32.mrb[2].mxu1  ;;  %v676_v48 = vmul.f32 %v662_v61, %v442_v29  ;;  %v678_v57 = vmul.f32 %v2203_v60, %v454_v43 }
 0x130   : > { %v446_v22 = vadd.f32 %v445_v19, %v322_v13  ;;  %v447_v23 = vpop.f32.mrb[3].mxu0  ;;  %v459_v24 = vpop.f32.mrb[3].mxu1  ;;  %v458_v35 = vadd.f32 %v457_v20, %v322_v13 }
 0x131   : > { %v448_v28 = vadd.f32 %v447_v23, %v326_v18  ;;  %v460_v45 = vadd.f32 %v459_v24, %v326_v18 }
 0x132   : > { %v653_v34 = vmul.f32 %v642_v56, %v446_v22  ;;  %v655_v5 = vmul.f32 %v650_v42, %v458_v35  ;;  %v698_v22 = vpop.permute.xlu1 %697  ;;  %v718_v35 = vpop.permute.xlu0 %717 }
 0x133   : > { %v528_v31 = vpop.f32.mrb[4].mxu1  ;;  %v1496_v32 = vpop.f32.mrb[4].mxu0  ;;  %v677_v44 = vmul.f32 %v666_v3, %v448_v28  ;;  %v679_v61 = vmul.f32 %v674_v47, %v460_v45  ;;  %v761_v45 = vld [vmem:[#allocation2 + $0xe8] sm:$0xff] }
 0x134   : > { %v623_v36 = vadd.f32 %v1496_v32, %v338_v25  ;;  %v530_v37 = vpop.f32.mrb[5].mxu1  ;;  %v617_v38 = vpop.f32.mrb[5].mxu0  ;;  %v529_v40 = vadd.f32 %v528_v31, %v2227_v27  ;;  %v751_v31 = vld [vmem:[#allocation2 + $0x98] sm:$0xff] }
 0x135   : > { %v618_v41 = vadd.f32 %v617_v38, %v338_v25  ;;  %v531_v50 = vadd.f32 %v530_v37, %v2231_v33  ;;  %v1644_v38 = vpack.c.bf16 %v751_v31, %v746_v30  ;;  %v1212_v30 = vld [vmem:[#allocation5 + $0x50] sm:$0xff]  ;;  %v1213_v31 = vld [vmem:[#allocation5 + $0x58] sm:$0xff] }
 0x136   : > { %v657_v46 = vadd.f32 %v653_v34, %v623_v36  ;;  %v700_v10 = vmul.f32 %v2199_v54, %v529_v40  ;;  %v722_v43 = vpop.permute.xlu1 %721 }
 0x137   : > { %v656_v51 = vadd.f32 %v652_v39, %v618_v41  ;;  %v534_v52 = vpop.f32.mrb[6].mxu1  ;;  %v1499_v56 = vpop.f32.mrb[6].mxu0  ;;  %v724_v23 = vmul.f32 %v2201_v55, %v531_v50 }
 0x138   : > { %v681_v59 = vadd.f32 %v677_v44, %v657_v46  ;;  %v535_v58 = vadd.f32 %v534_v52, %v2227_v27  ;;  %v633_v6 = vadd.f32 %v1499_v56, %v338_v25  ;;  %v627_v8 = vpop.f32.mrb[7].mxu0  ;;  %v536_v9 = vpop.f32.mrb[7].mxu1  ;;  %v756_v44 = vld [vmem:[#allocation2 + $0xc0] sm:$0xff]  ;;  %v781_v56 = vld [vmem:[#allocation2 + $0x188] sm:$0xff] }
 0x139   : > { %v680_v3 = vadd.f32 %v676_v48, %v656_v51  ;;  %v628_v13 = vadd.f32 %v627_v8, %v338_v25  ;;  %v537_v18 = vadd.f32 %v536_v9, %v2231_v33  ;;  %v776_v52 = vld [vmem:[#allocation2 + $0x160] sm:$0xff]  ;;  %v801_v9 = vld [vmem:[#allocation2 + $0x228] sm:$0xff] }
 0x13a   : > { %v701_v19 = vmul.f32 %v690_v16, %v535_v58  ;;  %v659_v20 = vadd.f32 %v655_v5, %v633_v6  ;;  %v791_v5 = vld [vmem:[#allocation2 + $0x1d8] sm:$0xff]  ;;  %v1656_v58 = vpack.c.bf16 %v781_v56, %v776_v52  ;;  %v796_v8 = vld [vmem:[#allocation2 + $0x200] sm:$0xff] }
 0x13b   : > { %v704_v24 = vadd.f32 %v700_v10, %v680_v3  ;;  %v658_v26 = vadd.f32 %v654_v49, %v628_v13  ;;  %v725_v28 = vmul.f32 %v2207_v63, %v537_v18  ;;  %v540_v29 = vpop.f32.mrb[8].mxu1  ;;  %v806_v10 = vld [vmem:[#allocation2 + $0x250] sm:$0xff]  ;;  %v811_v3 = vld [vmem:[#allocation2 + $0x278] sm:$0xff]  ;;  %v1203_v18 = vld [vmem:[#allocation5 + $0x8] sm:$0xff] }
 0x13c   : > { %v705_v54 = vadd.f32 %v701_v19, %v681_v59  ;;  %v683_v32 = vadd.f32 %v679_v61, %v659_v20  ;;  %v541_v25 = vadd.f32 %v540_v29, %v2227_v27  ;;  %v542_v34 = vpop.f32.mrb[9].mxu1  ;;  %v786_v59 = vld [vmem:[#allocation2 + $0x1b0] sm:$0xff]  ;;  %v1668_v13 = vpack.c.bf16 %v811_v3, %v806_v10  ;;  %v1205_v61 = vld [vmem:[#allocation5 + $0x18] sm:$0xff]  ;;  %v1206_v20 = vld [vmem:[#allocation5 + $0x20] sm:$0xff] }
 0x13d   : > { %v728_v60 = vadd.f32 %v724_v23, %v704_v24  ;;  %v682_v36 = vadd.f32 %v678_v57, %v658_v26  ;;  %v543_v16 = vadd.f32 %v542_v34, %v2231_v33  ;;  %v1660_v6 = vpack.c.bf16 %v791_v5, %v786_v59  ;;  %v1208_v23 = vld [vmem:[#allocation5 + $0x30] sm:$0xff]  ;;  %v1209_v26 = vld [vmem:[#allocation5 + $0x38] sm:$0xff]  ;;  %v812_v59 = vld [vmem:[%s2354_s4] sm:$0x1f] }
 0x13e   : > { %v2243_v37 = vadd.f32 %v725_v28, %v705_v54  ;;  %v702_v55 = vmul.f32 %v2218_v15, %v541_v25  ;;  %v1211_v28 = vld [vmem:[#allocation5 + $0x48] sm:$0xff]  ;;  %v1692_v54 = vpack.c.bf16 %v1213_v31, %v1212_v30 }
 0x13f   : > { %v726_v39 = vmul.f32 %v718_v35, %v543_v16  ;;  %v546_v63 = vpop.f32.mrb[10].mxu1  ;;  %1131 = vperm.xlu1 %1792, %v728_v60   ;;  %1104 = vperm.xlu0 %1791, %v728_v60   ;;  %v1215_v25 = vld [vmem:[#allocation5 + $0x68] sm:$0xff]  ;;  %v1216_v35 = vld [vmem:[#allocation5 + $0x70] sm:$0xff] }
 0x140   : > { %v706_v40 = vadd.f32 %v702_v55, %v682_v36  ;;  %v547_v41 = vadd.f32 %v546_v63, %v2227_v27  ;;  %904 = vmatmul.mubr.f32.vlgmr.msra.gmra.mrb[12].mxu1 %v728_v60  ;;  %993 = vmatmul.mubr.f32.vlgmr.msra.gmra.mrb[8].mxu0 %v728_v60  ;;  %v548_v42 = vpop.f32.mrb[11].mxu1  ;;  %v1648_v27 = vpack.c.bf16 %v761_v45, %v756_v44 }
 0x141   : > { %1643 = vmatpush3.bf16.msra.mxu1 %v2196_v53  ;;  %v549_v46 = vadd.f32 %v548_v42, %v2231_v33  ;;  %909 = vmatprep.mubr.f32.mxu1 %v1942_v0  ;;  %v766_v53 = vld [vmem:[#allocation2 + $0x110] sm:$0xff]  ;;  %v771_v33 = vld [vmem:[#allocation2 + $0x138] sm:$0xff] }
 0x142   : > { %v2250_v15 = vadd.f32 %v726_v39, %v706_v40  ;;  %v703_v47 = vmul.f32 %v698_v22, %v547_v41  ;;  %998 = vmatprep.mubr.f32.mxu0 %v1942_v0  ;;  %1645 = vmatprep.subr.bf16.mxu1 %v1644_v38  ;;  %v1652_v51 = vpack.c.bf16 %v771_v33, %v766_v53  ;;  %v1207_v22 = vld [vmem:[#allocation5 + $0x28] sm:$0xff] }
 0x143   : > { %v727_v48 = vmul.f32 %v722_v43, %v549_v46  ;;  %1793 = vset.pattern.permute.xlu1 %v1943_v1  ;;  %1794 = vset.pattern.permute.xlu0 %v1945_v12  ;;  %v1680_v24 = vpack.c.bf16 %v1207_v22, %v1206_v20 }
 0x144   : > { %v707_v49 = vadd.f32 %v703_v47, %v683_v32  ;;  %910 = vmatmul.mubr.f32.gmra.mrb[14].mxu1 %v2243_v37  ;;  %999 = vmatmul.mubr.f32.gmra.mrb[10].mxu0 %v2243_v37  ;;  %v1214_v32 = vld [vmem:[#allocation5 + $0x60] sm:$0xff] }
 0x145   : > { %1647 = vmatpush3.bf16.msra.mxu1 %v1644_v38  ;;  %1155 = vperm.xlu1 %1793, %v728_v60   ;;  %v1696_v34 = vpack.c.bf16 %v1215_v25, %v1214_v32 }
 0x146   : > { %v731_v50 = vadd.f32 %v727_v48, %v707_v49  ;;  %1179 = vperm.xlu0 %1794, %v728_v60   ;;  %915 = vmatprep.mubr.f32.mxu1 %v1942_v0 }
 0x147   : > { %1004 = vmatprep.mubr.f32.mxu0 %v1942_v0  ;;  %1649 = vmatprep.subr.bf16.mxu1 %v1648_v27 }
 0x148   : > { %916 = vmatmul.mubr.f32.gmra.mrb[16].mxu1 %v2250_v15  ;;  %1005 = vmatmul.mubr.f32.gmra.mrb[12].mxu0 %v2250_v15 }
 0x149   : > { %1651 = vmatpush3.bf16.msra.mxu1 %v1648_v27  ;;  %1795 = vset.pattern.permute.xlu1 %v1944_v2 }
 0x14a   : > { %1796 = vset.pattern.permute.xlu0 %v1946_v17  ;;  %1109 = vperm.xlu1 %1795, %v2243_v37  }
 0x14b   : > { %1135 = vperm.xlu0 %1796, %v2243_v37   ;;  %921 = vmatprep.mubr.f32.mxu1 %v1942_v0 }
 0x14c   : > { %1010 = vmatprep.mubr.f32.mxu0 %v1942_v0  ;;  %1653 = vmatprep.subr.bf16.mxu1 %v1652_v51  ;;  %v1664_v0 = vpack.c.bf16 %v801_v9, %v796_v8  ;;  %v825_v8 = vrot.slane %v812_v59, %v329_v14  ;;  %v821_v9 = vrot.slane %v812_v59, %v325_v7 }
 0x14d   : > { %922 = vmatmul.mubr.f32.gmra.mrb[18].mxu1 %v731_v50  ;;  %1011 = vmatmul.mubr.f32.gmra.mrb[14].mxu0 %v731_v50 }
 0x14e   : > { %1655 = vmatpush3.bf16.msra.mxu1 %v1652_v51  ;;  %1532 = vmatprep.mubr.f32.mxu1 %v728_v60  ;;  %v1217_v60 = vld [vmem:[#allocation5 + $0x78] sm:$0xff] }
 0x14f   : > { %1797 = vset.pattern.permute.xlu1 %v1943_v1  ;;  %1801 = vset.pattern.permute.xlu0 %v1943_v1  ;;  %v1700_v36 = vpack.c.bf16 %v1217_v60, %v1216_v35 }
 0x150   : > { %1159 = vperm.xlu1 %1797, %v2243_v37   ;;  %1163 = vperm.xlu0 %1801, %v2250_v15  }
 0x151   : > { %1657 = vmatprep.subr.bf16.mxu1 %v1656_v58 }
 0x152   : > { %1659 = vmatpush3.bf16.msra.mxu1 %v1656_v58 }
 0x153   : > { %1661 = vmatprep.subr.bf16.mxu1 %v1660_v6 }
 0x154   : > { %1798 = vset.pattern.permute.xlu1 %v1945_v12  ;;  %1802 = vset.pattern.permute.xlu0 %v1944_v2 }
 0x155   : > { %1183 = vperm.xlu1 %1798, %v2243_v37   ;;  %1119 = vperm.xlu0 %1802, %v731_v50  }
 0x156   : > { %1663 = vmatpush3.bf16.msra.mxu1 %v1660_v6  ;;  %v817_v6 = vrot.slane %v812_v59, %v321_v4 }
 0x157   : > { %1665 = vmatprep.subr.bf16.mxu1 %v1664_v0 }
 0x159   : > { %1799 = vset.pattern.permute.xlu1 %v1944_v2  ;;  %1805 = vset.pattern.permute.xlu0 %v1945_v12  ;;  %v1202_v2 = vld [vmem:[#allocation5] sm:$0xff] }
 0x15a   : > { %1667 = vmatpush3.bf16.msra.mxu1 %v1664_v0  ;;  %1114 = vperm.xlu1 %1799, %v2250_v15   ;;  %v1672_v57 = vpack.c.bf16 %v1203_v18, %v1202_v2  ;;  %v829_v0 = vrot.slane %v812_v59, %v333_v21 }
 0x15b   : > { %1191 = vperm.xlu0 %1805, %v731_v50   ;;  %1669 = vmatprep.subr.bf16.mxu1 %v1668_v13 }
 0x15c   : > { %1673 = vmatprep.subr.bf16.mxu0 %v1672_v57 }
 0x15d   : > { %1675 = vmatpush3.bf16.msra.mxu0 %v1672_v57 }
 0x15e   : > { %1671 = vmatpush3.bf16.msra.mxu1 %v1668_v13  ;;  %1800 = vset.pattern.permute.xlu1 %v1946_v17  ;;  %v1204_v17 = vld [vmem:[#allocation5 + $0x10] sm:$0xff]  ;;  %v833_v13 = vrot.slane %v812_v59, %v337_v11 }
 0x15f   : > { %1139 = vperm.xlu1 %1800, %v2250_v15   ;;  %v1676_v19 = vpack.c.bf16 %v1205_v61, %v1204_v17 }
 0x161   : > { %1533 = vmatmul.mubr.f32.vlgmr.msra.gmra.mrb[20].mxu1 %v2243_v37  ;;  %1677 = vmatprep.subr.bf16.mxu0 %v1676_v19 }
 0x162   : > { %1535 = vmatprep.mubr.f32.mxu1 %v2250_v15  ;;  %1679 = vmatpush3.bf16.msra.mxu0 %v1676_v19 }
 0x163   : > { %1143 = vperm.xlu1 %1800, %v731_v50   ;;  %1681 = vmatprep.subr.bf16.mxu0 %v1680_v24 }
 0x165   : > { %1536 = vmatmul.mubr.f32.gmra.mrb[22].mxu1 %v731_v50 }
 0x166   : > { %1683 = vmatpush3.bf16.msra.mxu0 %v1680_v24 }
 0x167   : > { %1803 = vset.pattern.permute.xlu1 %v1943_v1  ;;  %v1684_v1 = vpack.c.bf16 %v1209_v26, %v1208_v23 }
 0x168   : > { %1167 = vperm.xlu1 %1803, %v731_v50  }
 0x169   : > { %1685 = vmatprep.subr.bf16.mxu0 %v1684_v1 }
 0x16a   : > { %1687 = vmatpush3.bf16.msra.mxu0 %v1684_v1 }
 0x16c   : > { %1804 = vset.pattern.permute.xlu1 %v1945_v12  ;;  %v1210_v12 = vld [vmem:[#allocation5 + $0x40] sm:$0xff] }
 0x16d   : > { %1187 = vperm.xlu1 %1804, %v2250_v15   ;;  %v1688_v29 = vpack.c.bf16 %v1211_v28, %v1210_v12 }
 0x16f   : > { %1689 = vmatprep.subr.bf16.mxu0 %v1688_v29 }
 0x170   : > { %1691 = vmatpush3.bf16.msra.mxu0 %v1688_v29 }
 0x171   : > { %1693 = vmatprep.subr.bf16.mxu0 %v1692_v54 }
 0x174   : > { %1695 = vmatpush3.bf16.msra.mxu0 %v1692_v54 }
 0x175   : > { %1697 = vmatprep.subr.bf16.mxu0 %v1696_v34 }
 0x178   : > { %1699 = vmatpush3.bf16.msra.mxu0 %v1696_v34 }
 0x179   : > { %1701 = vmatprep.subr.bf16.mxu0 %v1700_v36 }
 0x17c   : > { %1703 = vmatpush3.bf16.msra.mxu0 %v1700_v36 }
 0x1be   : > { %v1132_v16 = vpop.permute.xlu1 %1131  ;;  %v1105_v27 = vpop.permute.xlu0 %1104 }
 0x1c4   : > { %v1156_v37 = vpop.permute.xlu1 %1155 }
 0x1c5   : > { %v1180_v52 = vpop.permute.xlu0 %1179 }
 0x1c9   : > { %v1110_v55 = vpop.permute.xlu1 %1109 }
 0x1ca   : > { %v1136_v5 = vpop.permute.xlu0 %1135 }
 0x1cf   : > { %v1160_v45 = vpop.permute.xlu1 %1159  ;;  %v1164_v2 = vpop.permute.xlu0 %1163 }
 0x1d4   : > { %v1184_v49 = vpop.permute.xlu1 %1183  ;;  %v1120_v31 = vpop.permute.xlu0 %1119 }
 0x1d9   : > { %v1115_v56 = vpop.permute.xlu1 %1114 }
 0x1de   : > { %v1140_v58 = vpop.permute.xlu1 %1139 }
 0x1e2   : > { %v1144_v17 = vpop.permute.xlu1 %1143 }
 0x1e7   : > { %v1168_v60 = vpop.permute.xlu1 %1167 }
 0x213   : > { %v905_v38 = vpop.f32.mrb[12].mxu1  ;;  %v994_v39 = vpop.f32.mrb[8].mxu0 }
 0x214   : > { %v907_v63 = vpop.f32.mrb[13].mxu1  ;;  %v996_v40 = vpop.f32.mrb[9].mxu0  ;;  %v906_v10 = vadd.f32 %v905_v38, %v817_v6  ;;  %v995_v18 = vadd.f32 %v994_v39, %v825_v8 }
 0x215   : > { %v908_v57 = vadd.f32 %v907_v63, %v821_v9  ;;  %v997_v61 = vadd.f32 %v996_v40, %v829_v0 }
 0x216   : > { %v1122_v22 = vmul.f32 %v1105_v27, %v906_v10  ;;  %v1170_v21 = vmul.f32 %v1156_v37, %v995_v18 }
 0x217   : > { %v911_v41 = vpop.f32.mrb[14].mxu1  ;;  %v1000_v42 = vpop.f32.mrb[10].mxu0  ;;  %v1146_v1 = vmul.f32 %v1132_v16, %v908_v57  ;;  %v1194_v62 = vmul.f32 %v1180_v52, %v997_v61 }
 0x218   : > { %v913_v43 = vpop.f32.mrb[15].mxu1  ;;  %v1002_v44 = vpop.f32.mrb[11].mxu0  ;;  %v912_v3 = vadd.f32 %v911_v41, %v817_v6  ;;  %v1001_v19 = vadd.f32 %v1000_v42, %v825_v8 }
 0x219   : > { %v914_v4 = vadd.f32 %v913_v43, %v821_v9  ;;  %v1003_v20 = vadd.f32 %v1002_v44, %v829_v0 }
 0x21a   : > { %v1123_v23 = vmul.f32 %v1110_v55, %v912_v3  ;;  %v1171_v54 = vmul.f32 %v1160_v45, %v1001_v19 }
 0x21b   : > { %v917_v46 = vpop.f32.mrb[16].mxu1  ;;  %v1006_v15 = vpop.f32.mrb[12].mxu0  ;;  %v1147_v11 = vmul.f32 %v1136_v5, %v914_v4  ;;  %v1195_v32 = vmul.f32 %v1184_v49, %v1003_v20 }
 0x21c   : > { %v919_v47 = vpop.f32.mrb[17].mxu1  ;;  %v1008_v48 = vpop.f32.mrb[13].mxu0  ;;  %v918_v12 = vadd.f32 %v917_v46, %v817_v6  ;;  %v1007_v16 = vadd.f32 %v1006_v15, %v825_v8 }
 0x21d   : > { %v920_v25 = vadd.f32 %v919_v47, %v821_v9  ;;  %v1009_v45 = vadd.f32 %v1008_v48, %v829_v0 }
 0x21e   : > { %v1124_v37 = vmul.f32 %v1115_v56, %v918_v12  ;;  %v1172_v59 = vmul.f32 %v1164_v2, %v1007_v16  ;;  %v1188_v56 = vpop.permute.xlu1 %1187 }
 0x21f   : > { %v1148_v27 = vmul.f32 %v1140_v58, %v920_v25 }
 0x220   : > { %v923_v53 = vpop.f32.mrb[18].mxu1  ;;  %v1012_v33 = vpop.f32.mrb[14].mxu0 }
 0x221   : > { %v925_v50 = vpop.f32.mrb[19].mxu1  ;;  %v1014_v51 = vpop.f32.mrb[15].mxu0  ;;  %v924_v7 = vadd.f32 %v923_v53, %v817_v6  ;;  %v1013_v55 = vadd.f32 %v1012_v33, %v825_v8 }
 0x222   : > { %v926_v29 = vadd.f32 %v925_v50, %v821_v9  ;;  %v1015_v43 = vadd.f32 %v1014_v51, %v829_v0  ;;  %v1192_v33 = vpop.permute.xlu0 %1191  ;;  %v1196_v9 = vmul.f32 %v1188_v56, %v1009_v45  ;;  %v1440_v0 = vld [vmem:[%s2356_s6] ss:$0 sm:$0xff] }
 0x223   : > { %v1125_v36 = vmul.f32 %v1120_v31, %v924_v7  ;;  %v1173_v53 = vmul.f32 %v1168_v60, %v1013_v55 }
 0x224   : > { %v1149_v42 = vmul.f32 %v1144_v17, %v926_v29  ;;  %v1197_v15 = vmul.f32 %v1192_v33, %v1015_v43 }
 0x234   : > { %v1534_v14 = vpop.f32.mrb[20].mxu1 }
 0x235   : > { %v1089_v24 = vadd.f32 %v1534_v14, %v833_v13  ;;  %v1083_v26 = vpop.f32.mrb[21].mxu1 }
 0x236   : > { %v1084_v28 = vadd.f32 %v1083_v26, %v833_v13 }
 0x237   : > { %v1127_v30 = vadd.f32 %v1123_v23, %v1089_v24 }
 0x238   : > { %v1126_v34 = vadd.f32 %v1122_v22, %v1084_v28  ;;  %v1537_v35 = vpop.f32.mrb[22].mxu1 }
 0x239   : > { %v1151_v38 = vadd.f32 %v1147_v11, %v1127_v30  ;;  %v1099_v39 = vadd.f32 %v1537_v35, %v833_v13  ;;  %v1093_v63 = vpop.f32.mrb[23].mxu1 }
 0x23a   : > { %v1150_v40 = vadd.f32 %v1146_v1, %v1126_v34  ;;  %v1094_v41 = vadd.f32 %v1093_v63, %v833_v13 }
 0x23b   : > { %v1175_v44 = vadd.f32 %v1171_v54, %v1151_v38  ;;  %v1129_v46 = vadd.f32 %v1125_v36, %v1099_v39 }
 0x23c   : > { %v1128_v49 = vadd.f32 %v1124_v37, %v1094_v41  ;;  %v1174_v47 = vadd.f32 %v1170_v21, %v1150_v40 }
 0x23d   : > { %v1199_v50 = vadd.f32 %v1195_v32, %v1175_v44  ;;  %v1153_v52 = vadd.f32 %v1149_v42, %v1129_v46 }
 0x23e   : > { %v1152_v5 = vadd.f32 %v1148_v27, %v1128_v49  ;;  %v1198_v6 = vadd.f32 %v1194_v62, %v1174_v47 }
 0x23f   : > { %v1177_v8 = vadd.f32 %v1173_v53, %v1153_v52 }
 0x240   : > { %1570 = vmatprep.mubr.f32.mxu0 %v1198_v6  ;;  %v1176_v51 = vadd.f32 %v1172_v59, %v1152_v5 }
 0x241   : > { %1571 = vmatmul.mubr.f32.vlgmr.msra.gmra.mrb[16].mxu0 %v1199_v50  ;;  %v1201_v58 = vadd.f32 %v1197_v15, %v1177_v8 }
 0x242   : > { %v1200_v48 = vadd.f32 %v1196_v9, %v1176_v51 }
 0x244   : > { %1573 = vmatprep.mubr.f32.mxu0 %v1200_v48 }
 0x245   : > { %1574 = vmatmul.mubr.f32.gmra.mrb[18].mxu0 %v1201_v58 }
 0x314   : > { %v1572_v10 = vpop.f32.mrb[16].mxu0 }
 0x315   : > { %v1297_v3 = vadd.f32 %v1572_v10, %v1440_v0  ;;  %v1291_v13 = vpop.f32.mrb[17].mxu0 }
 0x316   : > { %v1292_v2 = vadd.f32 %v1440_v0, %v1291_v13 }
 0x317   : > { %1311 = vst [vmem:[%s302_s21 + $0x8] sm:$0xff] %v1297_v3 }
 0x318   : > { %1310 = vst [vmem:[%s302_s21] sm:$0xff] %v1292_v2  ;;  %v1575_v18 = vpop.f32.mrb[18].mxu0 }
 0x319   : > { %v1307_v57 = vadd.f32 %v1575_v18, %v1440_v0  ;;  %v1301_v17 = vpop.f32.mrb[19].mxu0 }
 0x31a   : > { %v1302_v61 = vadd.f32 %v1440_v0, %v1301_v17 }
 0x31b   : > { %1313 = vst [vmem:[%s302_s21 + $0x18] sm:$0xff] %v1307_v57 }
 0x31c   : > { %1312 = vst [vmem:[%s302_s21 + $0x10] sm:$0xff] %v1302_v61 }
 0x31d   : > { %1877 = shalt.err (!%p1874_p11)
}
 0x31e   : > { %s1878_s19 = scalar_lea.hbm %s2307_s9, 512  ;;  %s1882_s18 = scalar_lea.hbm %s2357_s7, 1024 }
 0x31f   : > { %p1879_p13 = scmp.ne.s32.totalorder %s2307_s9, %s1878_s19  ;;  %p1883_p6 = scmp.lt.u32.totalorder %s2307_s9, %s2357_s7 }
 0x320   : > { %p1884_p9 = scmp.lt.u32.totalorder %s1882_s18, %s1878_s19  ;;  %p1886_p10 = scmp.lt.u32.totalorder %s1878_s19, %s2307_s9 }
 0x321   : > { %p1880_p0 = pnand %p1879_p13, %p2371_p1 }
 0x322   : > { %p1885_p12 = por %p1884_p9, %p1883_p6 }
 0x323   : > { %p1881_p5 = pneg %p1880_p0 }
 0x324   : > { %p1887_p2 = por %p1886_p10, %p1885_p12 }
 0x326   : > { %p1888_p3 = pnand %p1887_p2, %p1881_p5 }
 0x328   : > { %1891 = shalt.err (!%p1888_p3)
}
 0x329   : > { %s1948_s23 = smov 128   ;;  %s1949_s29 = smov 8  }
 0x32a   : > { %1714 = dma.vmem_to_hbm [thread:$0]  (%p2371_p1), %s2302_s22, 512, %s2307_s9, %s2309_s15, %s1948_s23, %s1948_s23, %s1949_s29  }
 0x32b PF: > { %p1731_p4 = scmp.ge.s32.totalorder %s1934_s27, 2  ;;  %s1343_s8 = sand.u32 1, %s1922_s24  }
 0x32c   : > { %p2372_p7 = scmp.ne.s32.totalorder %s2363_s12, 0  ;;  %s1344_s28 = scalar_lea.sflag [#allocation4], %s1343_s8 }
 0x32e   : > { %p1724_p8 = pnand %p1731_p4, %p2372_p7 }
 0x330   : > { %1917 = dma.done.wait (!%p1724_p8), %s1344_s28, 512  }
 0x331   : > { %1919 = vsyncadd (!%p1724_p8), %s1344_s28, 4294966784  ;;  %s2373_s10 = sld [smem:[#allocation11_spill]]  ;;  %p19_p11 = scmp.ge.s32.totalorder %s2015_s30, 4  }
 0x332   : > { %s2374_s24 = smov %s1926_s25  ;;  %s2375_s25 = smov %s1930_s26 }
 0x333   : > { %s2377_s27 = smov %s2015_s30  ;;  %21 = sbr.rel (!%p19_p11) target bundleno = 5 (0x5), region = 92 }
 0x337   : > { %s2376_s26 = smov %s2373_s10 }
 0x33a   :  { %1349 = vsyncpa [#allocation3], 1 }
 0x33b   :  { %1351 = vsyncpa [#allocation3 + $0x1], 1 }
 0x33c   :  { %1352 = vsyncpa [#allocation6], 1 }
 0x33d   :  { %1353 = vsyncpa [#allocation4], 1 }
 0x33e   :  { %1355 = vsyncpa [#allocation4 + $0x1], 1 }

</bundles_post_ra>
